<compile_context>
chip_gen: v7x
topology: tpu7x:2x2x1
jax: 0.10.0
libtpu: 0.0.40
codegen_flags: <defaults>
</compile_context>

<pallas_src>
import numpy as np
import jax
import jax.numpy as jnp
from jax.experimental import pallas as pl
from jax.experimental.pallas import tpu as pltpu

THRESHOLD = 0.5     # rrl.components.THRESHOLD (weight binarization threshold)
INIT_RANGE = 0.5    # rrl.components.INIT_RANGE
LANE = 128          # pad final output feature dim to the TPU lane width
CHUNK = 32          # log-of-product chunk (bounds EUP work and f32 underflow)


# ---------------------------------------------------------------------------
# Fused kernel: binarize -> union ... union (+residual) -> lr, both chains
# ---------------------------------------------------------------------------
def _make_fused_kernel(plan):
    """plan: d_disc, d_cont, unions=[{n, segs:(w,...)}...], n_lr_segs."""
    n_union = len(plan['unions'])
    d_disc, d_cont = plan['d_disc'], plan['d_cont']

    def kernel(*refs):
        it = iter(refs)
        x_ref = next(it)
        clt_ref = next(it)
        union_refs = []
        for uinfo in plan['unions']:
            thr_ref = next(it)
            seg_refs = [(next(it), next(it), next(it)) for _ in uinfo['segs']]
            union_refs.append((thr_ref, seg_refs))
        lr_refs = [next(it) for _ in range(plan['n_lr_segs'])]
        b_ref = next(it)
        cont_ref = next(it)
        bin_ref = next(it)

        f32 = jnp.float32
        x = x_ref[...].astype(f32)                     # (tb, d_disc + d_cont)
        tb = x.shape[0]

        # ---- BinarizeLayer (forward == binarized_forward): computed ONCE ----
        # Per-feature vectorized compare (n1 thresholds at a time) + one concat.
        # (A reshape-free full vectorization needs a precision-guaranteed
        #  one-hot expander matmul; kept simple here since d_cont is tiny.)
        parts = []
        if d_disc:
            parts.append(x[:, :d_disc])
        if d_cont:
            clt = clt_ref[...].astype(f32)             # (d_cont, n1) == cl.T
            pos_parts = [
                jnp.where(x[:, d_disc + f:d_disc + f + 1] > clt[f:f + 1, :],
                          1.0, 0.0)
                for f in range(d_cont)
            ]
            pos = (pos_parts[0] if d_cont == 1
                   else jnp.concatenate(pos_parts, axis=-1))
            parts += [pos, 1.0 - pos]
        xb = parts[0] if len(parts) == 1 else jnp.concatenate(parts, axis=-1)

        # ---- continuous UnionLayer: stacked conj|dis, chunked log-of-product -
        # arg column j<n : x*Wc + (1-Wc)  == 1 - (1-x)*Wc   (conjunction)
        # arg column j>=n: x*(-Wd) + 1    == 1 - x*Wd       (disjunction)
        def union_cont(segs, urefs):
            _, seg_refs = urefs
            n2 = seg_refs[0][0].shape[1]               # 2n (conj | dis)
            slog = None
            for h, (at_ref, bt_ref, _) in zip(segs, seg_refs):
                at = at_ref[...]                       # (w, 2n)
                bt = bt_ref[...]                       # (w, 2n)
                w = at.shape[0]
                # TODO(synk): for realistic In (hundreds+) replace this static
                # unroll with a blocked lax.fori_loop over input chunks.
                for c0 in range(0, w, CHUNK):
                    c1 = min(c0 + CHUNK, w)
                    p = None
                    for i in range(c0, c1):            # elementwise product
                        term = h[:, i:i + 1] * at[i:i + 1, :] + bt[i:i + 1, :]
                        p = term if p is None else p * term
                    p = jnp.maximum(p, 1e-30)          # guard log(0)/underflow
                    lg = jnp.log(p)                    # one EUP log per CHUNK
                    slog = lg if slog is None else slog + lg
            r = pl.reciprocal(1.0 - slog, approx=True)  # conj = 1/(1 - s)
            lane = jax.lax.broadcasted_iota(jnp.int32, (tb, n2), 1)
            return jnp.where(lane < (n2 // 2), r, 1.0 - r)   # dis = 1 - 1/(1-s)

        # ---- binarized UnionLayer: ONE bf16 MXU matmul + per-lane threshold --
        #   conj = 1[rowsum(Wcb) - x@Wcb^T < 0.5]  <=>  m > rowsum - 0.5
        #   dis  = 1[x@Wdb^T > 0.5]
        def union_bin(segs, urefs):
            thr_ref, seg_refs = urefs
            m = None
            for h, (_, _, wbt_ref) in zip(segs, seg_refs):
                d = jnp.dot(h.astype(jnp.bfloat16), wbt_ref[...],
                            preferred_element_type=f32)
                m = d if m is None else m + d
            return jnp.where(m > thr_ref[...], 1.0, 0.0)

        # ---- MLLP chain with residual handling (mirrors MLLP.*_forward); the
        # residual "concat" is expressed as weight segments, never materialized.
        def run_chain(union_fn):
            cur, x_res = xb, None
            for u in range(n_union):
                if u == 0:
                    cur = union_fn([cur], union_refs[0])
                else:
                    segs = [cur] if x_res is None else [cur, x_res]
                    x_res = cur
                    cur = union_fn(segs, union_refs[u])
            segs = [cur] if x_res is None else [cur, x_res]
            out = b_ref[...].astype(f32)               # (1, n_pad), lane-dense
            for h, wref in zip(segs, lr_refs):
                out = out + jnp.dot(h, wref[...], preferred_element_type=f32)
            return out

        cont_ref[...] = run_chain(union_cont).astype(cont_ref.dtype)
        bin_ref[...] = run_chain(union_bin).astype(bin_ref.dtype)

    return kernel


# ---------------------------------------------------------------------------
# Parameter init (mirrors MLLP.__init__), deterministic; torch-equivalent params
# ---------------------------------------------------------------------------
def init_mllp(key, dim_list, left=-1.0, right=1.0,
              union_init_range=INIT_RANGE, dtype=jnp.float32):
    layers, out_dims = [], []
    prev_dim = dim_list[0]
    keys = jax.random.split(key, 2 * len(dim_list) + 2)
    ki = 0
    for i in range(1, len(dim_list)):
        num = prev_dim
        if i >= 4:
            num = num + out_dims[-2]                  # residual concat width
        if i == 1:
            n = dim_list[i]
            d_disc, d_cont = num
            cl = left + jax.random.uniform(keys[ki], (n, d_cont),
                                           dtype=dtype) * (right - left)
            ki += 1
            out_dim = d_disc + n * d_cont * 2          # use_not=False
            layers.append(dict(type='binarize', d_disc=d_disc, d_cont=d_cont,
                               n=n, cl=cl, out=out_dim))
        elif i == len(dim_list) - 1:
            n = dim_list[i]
            bound = 1.0 / np.sqrt(num)                 # nn.Linear default init
            W = jax.random.uniform(keys[ki], (n, num), dtype=dtype,
                                   minval=-bound, maxval=bound)
            ki += 1
            b = jax.random.uniform(keys[ki], (1, n), dtype=dtype,
                                   minval=-bound, maxval=bound)
            ki += 1
            out_dim = n
            layers.append(dict(type='lr', W=W, b=b, out=out_dim))
        else:
            n = dim_list[i]
            Wc = union_init_range * jax.random.uniform(keys[ki], (n, num), dtype=dtype)
            ki += 1
            Wd = union_init_range * jax.random.uniform(keys[ki], (n, num), dtype=dtype)
            ki += 1
            out_dim = 2 * n
            layers.append(dict(type='union', Wc=Wc, Wd=Wd, out=out_dim))
        prev_dim = out_dim
        out_dims.append(out_dim)
    return layers


def _segment_widths(layers):
    """Per-union-layer / LR input segment widths (torch weight column order)."""
    outs = [l['out'] for l in layers]
    n_union = len(layers) - 2
    seg_w = []
    for u in range(n_union):
        if u <= 1:
            seg_w.append([outs[u]])                    # [xb] or [U0 out]
        else:
            seg_w.append([outs[u], outs[u - 1]])       # [cur, x_res]
    lr_w = [outs[n_union], outs[n_union - 1]] if n_union >= 2 else [outs[n_union]]
    return seg_w, lr_w


def pack_mllp(layers):
    """Preprocess params into kernel arrays (thresholded, transposed, stacked,
    segmented, lane-padded) + a static plan.  All done ONCE, not per forward."""
    bn, lr = layers[0], layers[-1]
    union_layers = layers[1:-1]
    seg_w, lr_segw = _segment_widths(layers)
    f32 = jnp.float32

    args = [bn['cl'].T.astype(f32)]                    # clt: (d_cont, n1)
    plan_unions = []
    for u, ul in enumerate(union_layers):
        Wc, Wd = ul['Wc'].astype(f32), ul['Wd'].astype(f32)    # (n, In)
        n = Wc.shape[0]
        Wcb = (Wc > THRESHOLD).astype(f32)
        Wdb = (Wd > THRESHOLD).astype(f32)
        thr = jnp.concatenate([jnp.sum(Wcb, axis=1, keepdims=True).T - 0.5,
                               jnp.full((1, n), 0.5, f32)], axis=1)   # (1, 2n)
        A = jnp.concatenate([Wc, -Wd], axis=0)                         # (2n, In)
        Bm = jnp.concatenate([1.0 - Wc, jnp.ones_like(Wd)], axis=0)    # (2n, In)
        Wb = jnp.concatenate([Wcb, Wdb], axis=0).astype(jnp.bfloat16)  # (2n, In)
        args.append(thr)
        off = 0
        for w in seg_w[u]:
            args += [A[:, off:off + w].T, Bm[:, off:off + w].T, Wb[:, off:off + w].T]
            off += w
        plan_unions.append(dict(n=n, segs=tuple(seg_w[u])))

    W, b = lr['W'].astype(f32), lr['b'].astype(f32)
    n_out = W.shape[0]
    n_pad = ((n_out + LANE - 1) // LANE) * LANE
    Wt_pad = jnp.zeros((W.shape[1], n_pad), f32).at[:, :n_out].set(W.T)
    b_pad = jnp.zeros((1, n_pad), f32).at[:, :n_out].set(b)
    off = 0
    for w in lr_segw:
        args.append(Wt_pad[off:off + w, :])
        off += w
    args.append(b_pad)

    plan = dict(d_disc=bn['d_disc'], d_cont=bn['d_cont'], n_bin=bn['n'],
                unions=plan_unions, n_lr_segs=len(lr_segw),
                n_out=n_out, n_pad=n_pad)
    return args, plan


# ---------------------------------------------------------------------------
# MLLP forward: single fused pallas_call, both chains
# ---------------------------------------------------------------------------
def mllp_forward(layers, x, batch_tile=None):
    args_w, plan = pack_mllp(layers)
    B = x.shape[0]
    n_out, n_pad = plan['n_out'], plan['n_pad']

    # Larger batch tiles fill the MXU / amortize grid-step overhead; on v7x use
    # >= 2 tiles so the "parallel" axis shards across both TensorCores.
    if batch_tile is None:
        batch_tile = B if B <= 512 else 512
    assert B % batch_tile == 0 and (batch_tile == B or batch_tile % 8 == 0)

    args = [x] + args_w

    def batch_spec(last):
        return pl.BlockSpec((batch_tile, last), lambda i: (i, 0))

    def full_spec(a):
        nd = a.ndim
        return pl.BlockSpec(tuple(a.shape), lambda i, _nd=nd: (0,) * _nd)

    in_specs = [batch_spec(x.shape[1])] + [full_spec(a) for a in args_w]
    out_specs = (batch_spec(n_pad), batch_spec(n_pad))
    out_shape = (jax.ShapeDtypeStruct((B, n_pad), jnp.float32),
                 jax.ShapeDtypeStruct((B, n_pad), jnp.float32))

    kernel = _make_fused_kernel(plan)
    cont_pad, bin_pad = pl.pallas_call(
        kernel,
        grid=(B // batch_tile,),
        in_specs=in_specs,
        out_specs=out_specs,
        out_shape=out_shape,
        compiler_params=pltpu.CompilerParams(dimension_semantics=("parallel",)),
    )(*args)
    # padded LR columns are zero; slice back to the true output width
    return cont_pad[:, :n_out], bin_pad[:, :n_out]


# ---------------------------------------------------------------------------
# Pure-JAX reference (mirrors the PyTorch math directly) for verification
# ---------------------------------------------------------------------------
def mllp_forward_ref(layers, x):
    def apply_ref(layer, x, binarized):
        if layer['type'] == 'binarize':
            d = layer['d_disc']
            x_disc, x_cont = x[:, :d], x[:, d:]
            diff = x_cont[:, :, None] - layer['cl'].T[None, :, :]   # (B,d_cont,n)
            pos = (diff > 0).astype(x.dtype).reshape(x.shape[0], -1)
            return jnp.concatenate([x_disc, pos, 1.0 - pos], axis=1)
        if layer['type'] == 'union':
            Wc, Wd = layer['Wc'], layer['Wd']
            if binarized:
                wcb = (Wc > THRESHOLD).astype(x.dtype)
                wdb = (Wd > THRESHOLD).astype(x.dtype)
                conj = jnp.prod(1.0 - (1.0 - x)[:, :, None] * wcb.T[None, :, :], axis=1)
                dis = 1.0 - jnp.prod(1.0 - x[:, :, None] * wdb.T[None, :, :], axis=1)
            else:
                sc = jnp.sum(jnp.log(1.0 - (1.0 - x)[:, :, None] * Wc.T[None, :, :]), axis=1)
                sd = jnp.sum(jnp.log(1.0 - x[:, :, None] * Wd.T[None, :, :]), axis=1)
                conj = -1.0 / (-1.0 + sc)
                dis = 1.0 - (-1.0 / (-1.0 + sd))
            return jnp.concatenate([conj, dis], axis=1)
        return x @ layer['W'].T + layer['b']

    def run(binarized):
        cur, x_res = x, None
        for i, layer in enumerate(layers):
            if i <= 1:
                cur = apply_ref(layer, cur, binarized)
            else:
                x_cat = jnp.concatenate([cur, x_res], axis=1) if x_res is not None else cur
                x_res = cur
                cur = apply_ref(layer, x_cat, binarized)
        return cur

    return run(False), run(True)


if __name__ == "__main__":
    # dim_list[0] is (n_discrete_features, n_continuous_features), as in RRL.
    dim_list = [(4, 4), 4, 16, 16, 4]   # binarize -> union -> union -> lr(+residual)
    B = 8

    key = jax.random.PRNGKey(0)
    k_param, k_disc, k_cont = jax.random.split(key, 3)
    # Widen the union-weight init range (PyTorch default INIT_RANGE=0.5) so the
    # hard-thresholded binarized path is exercised on both sides of 0.5.
    layers = init_mllp(k_param, dim_list, union_init_range=1.0)

    # Discrete features are binary in RRL, as the binarized chain assumes.
    x_disc = jax.random.bernoulli(k_disc, 0.5, (B, dim_list[0][0])).astype(jnp.float32)
    x_cont = jax.random.uniform(k_cont, (B, dim_list[0][1]),
                                minval=-1.0, maxval=1.0, dtype=jnp.float32)
    x = jnp.concatenate([x_disc, x_cont], axis=1)        # (8, 8)

    fwd = jax.jit(lambda xx: mllp_forward(layers, xx))
    cont_out, bin_out = fwd(x)
    jax.block_until_ready((cont_out, bin_out))

    # sanity check against the plain-JAX reference (mirrors the PyTorch math)
    ref_cont, ref_bin = mllp_forward_ref(layers, x)
    assert cont_out.shape == (B, dim_list[-1]) and bin_out.shape == (B, dim_list[-1])
    # binarized chain: integer counts + f32 LR -> tight tolerance
    np.testing.assert_allclose(np.asarray(bin_out), np.asarray(ref_bin),
                               atol=5e-3, rtol=5e-3)
    # continuous chain: approx EUP reciprocal + chunked log-of-product -> looser
    np.testing.assert_allclose(np.asarray(cont_out), np.asarray(ref_cont),
                               atol=5e-2, rtol=5e-2)

    print("KERNEL_OK")
</pallas_src>

<mosaic_0001>
module attributes {stable_mosaic.version = 11 : i64} {
  func.func @kernel(%arg0: i32, %arg1: memref<8x8xf32, #tpu.memory_space<vmem>>, %arg2: memref<4x4xf32, #tpu.memory_space<vmem>>, %arg3: memref<1x32xf32, #tpu.memory_space<vmem>>, %arg4: memref<36x32xf32, #tpu.memory_space<vmem>>, %arg5: memref<36x32xf32, #tpu.memory_space<vmem>>, %arg6: memref<36x32xbf16, #tpu.memory_space<vmem>>, %arg7: memref<1x32xf32, #tpu.memory_space<vmem>>, %arg8: memref<32x32xf32, #tpu.memory_space<vmem>>, %arg9: memref<32x32xf32, #tpu.memory_space<vmem>>, %arg10: memref<32x32xbf16, #tpu.memory_space<vmem>>, %arg11: memref<32x128xf32, #tpu.memory_space<vmem>>, %arg12: memref<32x128xf32, #tpu.memory_space<vmem>>, %arg13: memref<1x128xf32, #tpu.memory_space<vmem>>, %arg14: memref<8x128xf32, #tpu.memory_space<vmem>>, %arg15: memref<8x128xf32, #tpu.memory_space<vmem>>) attributes {dimension_semantics = [#tpu.dimension_semantics<parallel>], iteration_bounds = array<i64: 1>, scalar_prefetch = 0 : i64, scratch_operands = 0 : i64, tpu.core_type = #tpu.core_type<tc>, window_params = [{transform_indices = @transform_0, window_bounds = array<i64: 8, 8>}, {pipeline_mode = #tpu.pipeline_mode<synchronous>, transform_indices = @transform_1, window_bounds = array<i64: 4, 4>}, {pipeline_mode = #tpu.pipeline_mode<synchronous>, transform_indices = @transform_2, window_bounds = array<i64: 1, 32>}, {pipeline_mode = #tpu.pipeline_mode<synchronous>, transform_indices = @transform_3, window_bounds = array<i64: 36, 32>}, {pipeline_mode = #tpu.pipeline_mode<synchronous>, transform_indices = @transform_4, window_bounds = array<i64: 36, 32>}, {pipeline_mode = #tpu.pipeline_mode<synchronous>, transform_indices = @transform_5, window_bounds = array<i64: 36, 32>}, {pipeline_mode = #tpu.pipeline_mode<synchronous>, transform_indices = @transform_6, window_bounds = array<i64: 1, 32>}, {pipeline_mode = #tpu.pipeline_mode<synchronous>, transform_indices = @transform_7, window_bounds = array<i64: 32, 32>}, {pipeline_mode = #tpu.pipeline_mode<synchronous>, transform_indices = @transform_8, window_bounds = array<i64: 32, 32>}, {pipeline_mode = #tpu.pipeline_mode<synchronous>, transform_indices = @transform_9, window_bounds = array<i64: 32, 32>}, {pipeline_mode = #tpu.pipeline_mode<synchronous>, transform_indices = @transform_10, window_bounds = array<i64: 32, 128>}, {pipeline_mode = #tpu.pipeline_mode<synchronous>, transform_indices = @transform_11, window_bounds = array<i64: 32, 128>}, {pipeline_mode = #tpu.pipeline_mode<synchronous>, transform_indices = @transform_12, window_bounds = array<i64: 1, 128>}, {transform_indices = @transform_13, window_bounds = array<i64: 8, 128>}, {transform_indices = @transform_14, window_bounds = array<i64: 8, 128>}]} {
    %c0 = arith.constant 0 : index
    %c0_0 = arith.constant 0 : index
    %0 = vector.load %arg1[%c0, %c0_0] : memref<8x8xf32, #tpu.memory_space<vmem>>, vector<8x8xf32>
    %1 = vector.extract_strided_slice %0 {offsets = [0, 0], sizes = [8, 4], strides = [1, 1]} : vector<8x8xf32> to vector<8x4xf32>
    %c0_1 = arith.constant 0 : index
    %c0_2 = arith.constant 0 : index
    %2 = vector.load %arg2[%c0_1, %c0_2] : memref<4x4xf32, #tpu.memory_space<vmem>>, vector<4x4xf32>
    %3 = vector.extract_strided_slice %0 {offsets = [0, 4], sizes = [8, 1], strides = [1, 1]} : vector<8x8xf32> to vector<8x1xf32>
    %4 = vector.extract_strided_slice %2 {offsets = [0, 0], sizes = [1, 4], strides = [1, 1]} : vector<4x4xf32> to vector<1x4xf32>
    %5 = vector.broadcast %3 : vector<8x1xf32> to vector<8x4xf32>
    %6 = vector.broadcast %4 : vector<1x4xf32> to vector<8x4xf32>
    %7 = arith.cmpf ogt, %5, %6 : vector<8x4xf32>
    %cst = arith.constant 1.000000e+00 : f32
    %cst_3 = arith.constant 0.000000e+00 : f32
    %8 = vector.broadcast %cst : f32 to vector<8x4xf32>
    %9 = vector.broadcast %cst_3 : f32 to vector<8x4xf32>
    %10 = arith.select %7, %8, %9 : vector<8x4xi1>, vector<8x4xf32>
    %11 = vector.extract_strided_slice %0 {offsets = [0, 5], sizes = [8, 1], strides = [1, 1]} : vector<8x8xf32> to vector<8x1xf32>
    %12 = vector.extract_strided_slice %2 {offsets = [1, 0], sizes = [1, 4], strides = [1, 1]} : vector<4x4xf32> to vector<1x4xf32>
    %13 = vector.broadcast %11 : vector<8x1xf32> to vector<8x4xf32>
    %14 = vector.broadcast %12 : vector<1x4xf32> to vector<8x4xf32>
    %15 = arith.cmpf ogt, %13, %14 : vector<8x4xf32>
    %cst_4 = arith.constant 1.000000e+00 : f32
    %cst_5 = arith.constant 0.000000e+00 : f32
    %16 = vector.broadcast %cst_4 : f32 to vector<8x4xf32>
    %17 = vector.broadcast %cst_5 : f32 to vector<8x4xf32>
    %18 = arith.select %15, %16, %17 : vector<8x4xi1>, vector<8x4xf32>
    %19 = vector.extract_strided_slice %0 {offsets = [0, 6], sizes = [8, 1], strides = [1, 1]} : vector<8x8xf32> to vector<8x1xf32>
    %20 = vector.extract_strided_slice %2 {offsets = [2, 0], sizes = [1, 4], strides = [1, 1]} : vector<4x4xf32> to vector<1x4xf32>
    %21 = vector.broadcast %19 : vector<8x1xf32> to vector<8x4xf32>
    %22 = vector.broadcast %20 : vector<1x4xf32> to vector<8x4xf32>
    %23 = arith.cmpf ogt, %21, %22 : vector<8x4xf32>
    %cst_6 = arith.constant 1.000000e+00 : f32
    %cst_7 = arith.constant 0.000000e+00 : f32
    %24 = vector.broadcast %cst_6 : f32 to vector<8x4xf32>
    %25 = vector.broadcast %cst_7 : f32 to vector<8x4xf32>
    %26 = arith.select %23, %24, %25 : vector<8x4xi1>, vector<8x4xf32>
    %27 = vector.extract_strided_slice %0 {offsets = [0, 7], sizes = [8, 1], strides = [1, 1]} : vector<8x8xf32> to vector<8x1xf32>
    %28 = vector.extract_strided_slice %2 {offsets = [3, 0], sizes = [1, 4], strides = [1, 1]} : vector<4x4xf32> to vector<1x4xf32>
    %29 = vector.broadcast %27 : vector<8x1xf32> to vector<8x4xf32>
    %30 = vector.broadcast %28 : vector<1x4xf32> to vector<8x4xf32>
    %31 = arith.cmpf ogt, %29, %30 : vector<8x4xf32>
    %cst_8 = arith.constant 1.000000e+00 : f32
    %cst_9 = arith.constant 0.000000e+00 : f32
    %32 = vector.broadcast %cst_8 : f32 to vector<8x4xf32>
    %33 = vector.broadcast %cst_9 : f32 to vector<8x4xf32>
    %34 = arith.select %31, %32, %33 : vector<8x4xi1>, vector<8x4xf32>
    %35 = tpu.concatenate %10, %18, %26, %34 in 1 : vector<8x4xf32>, vector<8x4xf32>, vector<8x4xf32>, vector<8x4xf32> -> vector<8x16xf32>
    %cst_10 = arith.constant 1.000000e+00 : f32
    %36 = vector.broadcast %cst_10 : f32 to vector<8x16xf32>
    %37 = arith.subf %36, %35 : vector<8x16xf32>
    %38 = tpu.concatenate %1, %35, %37 in 1 : vector<8x4xf32>, vector<8x16xf32>, vector<8x16xf32> -> vector<8x36xf32>
    %c0_11 = arith.constant 0 : index
    %c0_12 = arith.constant 0 : index
    %39 = vector.load %arg4[%c0_11, %c0_12] : memref<36x32xf32, #tpu.memory_space<vmem>>, vector<36x32xf32>
    %c0_13 = arith.constant 0 : index
    %c0_14 = arith.constant 0 : index
    %40 = vector.load %arg5[%c0_13, %c0_14] : memref<36x32xf32, #tpu.memory_space<vmem>>, vector<36x32xf32>
    %41 = vector.extract_strided_slice %38 {offsets = [0, 0], sizes = [8, 1], strides = [1, 1]} : vector<8x36xf32> to vector<8x1xf32>
    %42 = vector.extract_strided_slice %39 {offsets = [0, 0], sizes = [1, 32], strides = [1, 1]} : vector<36x32xf32> to vector<1x32xf32>
    %43 = vector.broadcast %41 : vector<8x1xf32> to vector<8x32xf32>
    %44 = vector.broadcast %42 : vector<1x32xf32> to vector<8x32xf32>
    %45 = arith.mulf %43, %44 : vector<8x32xf32>
    %46 = vector.extract_strided_slice %40 {offsets = [0, 0], sizes = [1, 32], strides = [1, 1]} : vector<36x32xf32> to vector<1x32xf32>
    %47 = vector.broadcast %46 : vector<1x32xf32> to vector<8x32xf32>
    %48 = arith.addf %45, %47 : vector<8x32xf32>
    %49 = vector.extract_strided_slice %38 {offsets = [0, 1], sizes = [8, 1], strides = [1, 1]} : vector<8x36xf32> to vector<8x1xf32>
    %50 = vector.extract_strided_slice %39 {offsets = [1, 0], sizes = [1, 32], strides = [1, 1]} : vector<36x32xf32> to vector<1x32xf32>
    %51 = vector.broadcast %49 : vector<8x1xf32> to vector<8x32xf32>
    %52 = vector.broadcast %50 : vector<1x32xf32> to vector<8x32xf32>
    %53 = arith.mulf %51, %52 : vector<8x32xf32>
    %54 = vector.extract_strided_slice %40 {offsets = [1, 0], sizes = [1, 32], strides = [1, 1]} : vector<36x32xf32> to vector<1x32xf32>
    %55 = vector.broadcast %54 : vector<1x32xf32> to vector<8x32xf32>
    %56 = arith.addf %53, %55 : vector<8x32xf32>
    %57 = arith.mulf %48, %56 : vector<8x32xf32>
    %58 = vector.extract_strided_slice %38 {offsets = [0, 2], sizes = [8, 1], strides = [1, 1]} : vector<8x36xf32> to vector<8x1xf32>
    %59 = vector.extract_strided_slice %39 {offsets = [2, 0], sizes = [1, 32], strides = [1, 1]} : vector<36x32xf32> to vector<1x32xf32>
    %60 = vector.broadcast %58 : vector<8x1xf32> to vector<8x32xf32>
    %61 = vector.broadcast %59 : vector<1x32xf32> to vector<8x32xf32>
    %62 = arith.mulf %60, %61 : vector<8x32xf32>
    %63 = vector.extract_strided_slice %40 {offsets = [2, 0], sizes = [1, 32], strides = [1, 1]} : vector<36x32xf32> to vector<1x32xf32>
    %64 = vector.broadcast %63 : vector<1x32xf32> to vector<8x32xf32>
    %65 = arith.addf %62, %64 : vector<8x32xf32>
    %66 = arith.mulf %57, %65 : vector<8x32xf32>
    %67 = vector.extract_strided_slice %38 {offsets = [0, 3], sizes = [8, 1], strides = [1, 1]} : vector<8x36xf32> to vector<8x1xf32>
    %68 = vector.extract_strided_slice %39 {offsets = [3, 0], sizes = [1, 32], strides = [1, 1]} : vector<36x32xf32> to vector<1x32xf32>
    %69 = vector.broadcast %67 : vector<8x1xf32> to vector<8x32xf32>
    %70 = vector.broadcast %68 : vector<1x32xf32> to vector<8x32xf32>
    %71 = arith.mulf %69, %70 : vector<8x32xf32>
    %72 = vector.extract_strided_slice %40 {offsets = [3, 0], sizes = [1, 32], strides = [1, 1]} : vector<36x32xf32> to vector<1x32xf32>
    %73 = vector.broadcast %72 : vector<1x32xf32> to vector<8x32xf32>
    %74 = arith.addf %71, %73 : vector<8x32xf32>
    %75 = arith.mulf %66, %74 : vector<8x32xf32>
    %76 = vector.extract_strided_slice %38 {offsets = [0, 4], sizes = [8, 1], strides = [1, 1]} : vector<8x36xf32> to vector<8x1xf32>
    %77 = vector.extract_strided_slice %39 {offsets = [4, 0], sizes = [1, 32], strides = [1, 1]} : vector<36x32xf32> to vector<1x32xf32>
    %78 = vector.broadcast %76 : vector<8x1xf32> to vector<8x32xf32>
    %79 = vector.broadcast %77 : vector<1x32xf32> to vector<8x32xf32>
    %80 = arith.mulf %78, %79 : vector<8x32xf32>
    %81 = vector.extract_strided_slice %40 {offsets = [4, 0], sizes = [1, 32], strides = [1, 1]} : vector<36x32xf32> to vector<1x32xf32>
    %82 = vector.broadcast %81 : vector<1x32xf32> to vector<8x32xf32>
    %83 = arith.addf %80, %82 : vector<8x32xf32>
    %84 = arith.mulf %75, %83 : vector<8x32xf32>
    %85 = vector.extract_strided_slice %38 {offsets = [0, 5], sizes = [8, 1], strides = [1, 1]} : vector<8x36xf32> to vector<8x1xf32>
    %86 = vector.extract_strided_slice %39 {offsets = [5, 0], sizes = [1, 32], strides = [1, 1]} : vector<36x32xf32> to vector<1x32xf32>
    %87 = vector.broadcast %85 : vector<8x1xf32> to vector<8x32xf32>
    %88 = vector.broadcast %86 : vector<1x32xf32> to vector<8x32xf32>
    %89 = arith.mulf %87, %88 : vector<8x32xf32>
    %90 = vector.extract_strided_slice %40 {offsets = [5, 0], sizes = [1, 32], strides = [1, 1]} : vector<36x32xf32> to vector<1x32xf32>
    %91 = vector.broadcast %90 : vector<1x32xf32> to vector<8x32xf32>
    %92 = arith.addf %89, %91 : vector<8x32xf32>
    %93 = arith.mulf %84, %92 : vector<8x32xf32>
    %94 = vector.extract_strided_slice %38 {offsets = [0, 6], sizes = [8, 1], strides = [1, 1]} : vector<8x36xf32> to vector<8x1xf32>
    %95 = vector.extract_strided_slice %39 {offsets = [6, 0], sizes = [1, 32], strides = [1, 1]} : vector<36x32xf32> to vector<1x32xf32>
    %96 = vector.broadcast %94 : vector<8x1xf32> to vector<8x32xf32>
    %97 = vector.broadcast %95 : vector<1x32xf32> to vector<8x32xf32>
    %98 = arith.mulf %96, %97 : vector<8x32xf32>
    %99 = vector.extract_strided_slice %40 {offsets = [6, 0], sizes = [1, 32], strides = [1, 1]} : vector<36x32xf32> to vector<1x32xf32>
    %100 = vector.broadcast %99 : vector<1x32xf32> to vector<8x32xf32>
    %101 = arith.addf %98, %100 : vector<8x32xf32>
    %102 = arith.mulf %93, %101 : vector<8x32xf32>
    %103 = vector.extract_strided_slice %38 {offsets = [0, 7], sizes = [8, 1], strides = [1, 1]} : vector<8x36xf32> to vector<8x1xf32>
    %104 = vector.extract_strided_slice %39 {offsets = [7, 0], sizes = [1, 32], strides = [1, 1]} : vector<36x32xf32> to vector<1x32xf32>
    %105 = vector.broadcast %103 : vector<8x1xf32> to vector<8x32xf32>
    %106 = vector.broadcast %104 : vector<1x32xf32> to vector<8x32xf32>
    %107 = arith.mulf %105, %106 : vector<8x32xf32>
    %108 = vector.extract_strided_slice %40 {offsets = [7, 0], sizes = [1, 32], strides = [1, 1]} : vector<36x32xf32> to vector<1x32xf32>
    %109 = vector.broadcast %108 : vector<1x32xf32> to vector<8x32xf32>
    %110 = arith.addf %107, %109 : vector<8x32xf32>
    %111 = arith.mulf %102, %110 : vector<8x32xf32>
    %112 = vector.extract_strided_slice %38 {offsets = [0, 8], sizes = [8, 1], strides = [1, 1]} : vector<8x36xf32> to vector<8x1xf32>
    %113 = vector.extract_strided_slice %39 {offsets = [8, 0], sizes = [1, 32], strides = [1, 1]} : vector<36x32xf32> to vector<1x32xf32>
    %114 = vector.broadcast %112 : vector<8x1xf32> to vector<8x32xf32>
    %115 = vector.broadcast %113 : vector<1x32xf32> to vector<8x32xf32>
    %116 = arith.mulf %114, %115 : vector<8x32xf32>
    %117 = vector.extract_strided_slice %40 {offsets = [8, 0], sizes = [1, 32], strides = [1, 1]} : vector<36x32xf32> to vector<1x32xf32>
    %118 = vector.broadcast %117 : vector<1x32xf32> to vector<8x32xf32>
    %119 = arith.addf %116, %118 : vector<8x32xf32>
    %120 = arith.mulf %111, %119 : vector<8x32xf32>
    %121 = vector.extract_strided_slice %38 {offsets = [0, 9], sizes = [8, 1], strides = [1, 1]} : vector<8x36xf32> to vector<8x1xf32>
    %122 = vector.extract_strided_slice %39 {offsets = [9, 0], sizes = [1, 32], strides = [1, 1]} : vector<36x32xf32> to vector<1x32xf32>
    %123 = vector.broadcast %121 : vector<8x1xf32> to vector<8x32xf32>
    %124 = vector.broadcast %122 : vector<1x32xf32> to vector<8x32xf32>
    %125 = arith.mulf %123, %124 : vector<8x32xf32>
    %126 = vector.extract_strided_slice %40 {offsets = [9, 0], sizes = [1, 32], strides = [1, 1]} : vector<36x32xf32> to vector<1x32xf32>
    %127 = vector.broadcast %126 : vector<1x32xf32> to vector<8x32xf32>
    %128 = arith.addf %125, %127 : vector<8x32xf32>
    %129 = arith.mulf %120, %128 : vector<8x32xf32>
    %130 = vector.extract_strided_slice %38 {offsets = [0, 10], sizes = [8, 1], strides = [1, 1]} : vector<8x36xf32> to vector<8x1xf32>
    %131 = vector.extract_strided_slice %39 {offsets = [10, 0], sizes = [1, 32], strides = [1, 1]} : vector<36x32xf32> to vector<1x32xf32>
    %132 = vector.broadcast %130 : vector<8x1xf32> to vector<8x32xf32>
    %133 = vector.broadcast %131 : vector<1x32xf32> to vector<8x32xf32>
    %134 = arith.mulf %132, %133 : vector<8x32xf32>
    %135 = vector.extract_strided_slice %40 {offsets = [10, 0], sizes = [1, 32], strides = [1, 1]} : vector<36x32xf32> to vector<1x32xf32>
    %136 = vector.broadcast %135 : vector<1x32xf32> to vector<8x32xf32>
    %137 = arith.addf %134, %136 : vector<8x32xf32>
    %138 = arith.mulf %129, %137 : vector<8x32xf32>
    %139 = vector.extract_strided_slice %38 {offsets = [0, 11], sizes = [8, 1], strides = [1, 1]} : vector<8x36xf32> to vector<8x1xf32>
    %140 = vector.extract_strided_slice %39 {offsets = [11, 0], sizes = [1, 32], strides = [1, 1]} : vector<36x32xf32> to vector<1x32xf32>
    %141 = vector.broadcast %139 : vector<8x1xf32> to vector<8x32xf32>
    %142 = vector.broadcast %140 : vector<1x32xf32> to vector<8x32xf32>
    %143 = arith.mulf %141, %142 : vector<8x32xf32>
    %144 = vector.extract_strided_slice %40 {offsets = [11, 0], sizes = [1, 32], strides = [1, 1]} : vector<36x32xf32> to vector<1x32xf32>
    %145 = vector.broadcast %144 : vector<1x32xf32> to vector<8x32xf32>
    %146 = arith.addf %143, %145 : vector<8x32xf32>
    %147 = arith.mulf %138, %146 : vector<8x32xf32>
    %148 = vector.extract_strided_slice %38 {offsets = [0, 12], sizes = [8, 1], strides = [1, 1]} : vector<8x36xf32> to vector<8x1xf32>
    %149 = vector.extract_strided_slice %39 {offsets = [12, 0], sizes = [1, 32], strides = [1, 1]} : vector<36x32xf32> to vector<1x32xf32>
    %150 = vector.broadcast %148 : vector<8x1xf32> to vector<8x32xf32>
    %151 = vector.broadcast %149 : vector<1x32xf32> to vector<8x32xf32>
    %152 = arith.mulf %150, %151 : vector<8x32xf32>
    %153 = vector.extract_strided_slice %40 {offsets = [12, 0], sizes = [1, 32], strides = [1, 1]} : vector<36x32xf32> to vector<1x32xf32>
    %154 = vector.broadcast %153 : vector<1x32xf32> to vector<8x32xf32>
    %155 = arith.addf %152, %154 : vector<8x32xf32>
    %156 = arith.mulf %147, %155 : vector<8x32xf32>
    %157 = vector.extract_strided_slice %38 {offsets = [0, 13], sizes = [8, 1], strides = [1, 1]} : vector<8x36xf32> to vector<8x1xf32>
    %158 = vector.extract_strided_slice %39 {offsets = [13, 0], sizes = [1, 32], strides = [1, 1]} : vector<36x32xf32> to vector<1x32xf32>
    %159 = vector.broadcast %157 : vector<8x1xf32> to vector<8x32xf32>
    %160 = vector.broadcast %158 : vector<1x32xf32> to vector<8x32xf32>
    %161 = arith.mulf %159, %160 : vector<8x32xf32>
    %162 = vector.extract_strided_slice %40 {offsets = [13, 0], sizes = [1, 32], strides = [1, 1]} : vector<36x32xf32> to vector<1x32xf32>
    %163 = vector.broadcast %162 : vector<1x32xf32> to vector<8x32xf32>
    %164 = arith.addf %161, %163 : vector<8x32xf32>
    %165 = arith.mulf %156, %164 : vector<8x32xf32>
    %166 = vector.extract_strided_slice %38 {offsets = [0, 14], sizes = [8, 1], strides = [1, 1]} : vector<8x36xf32> to vector<8x1xf32>
    %167 = vector.extract_strided_slice %39 {offsets = [14, 0], sizes = [1, 32], strides = [1, 1]} : vector<36x32xf32> to vector<1x32xf32>
    %168 = vector.broadcast %166 : vector<8x1xf32> to vector<8x32xf32>
    %169 = vector.broadcast %167 : vector<1x32xf32> to vector<8x32xf32>
    %170 = arith.mulf %168, %169 : vector<8x32xf32>
    %171 = vector.extract_strided_slice %40 {offsets = [14, 0], sizes = [1, 32], strides = [1, 1]} : vector<36x32xf32> to vector<1x32xf32>
    %172 = vector.broadcast %171 : vector<1x32xf32> to vector<8x32xf32>
    %173 = arith.addf %170, %172 : vector<8x32xf32>
    %174 = arith.mulf %165, %173 : vector<8x32xf32>
    %175 = vector.extract_strided_slice %38 {offsets = [0, 15], sizes = [8, 1], strides = [1, 1]} : vector<8x36xf32> to vector<8x1xf32>
    %176 = vector.extract_strided_slice %39 {offsets = [15, 0], sizes = [1, 32], strides = [1, 1]} : vector<36x32xf32> to vector<1x32xf32>
    %177 = vector.broadcast %175 : vector<8x1xf32> to vector<8x32xf32>
    %178 = vector.broadcast %176 : vector<1x32xf32> to vector<8x32xf32>
    %179 = arith.mulf %177, %178 : vector<8x32xf32>
    %180 = vector.extract_strided_slice %40 {offsets = [15, 0], sizes = [1, 32], strides = [1, 1]} : vector<36x32xf32> to vector<1x32xf32>
    %181 = vector.broadcast %180 : vector<1x32xf32> to vector<8x32xf32>
    %182 = arith.addf %179, %181 : vector<8x32xf32>
    %183 = arith.mulf %174, %182 : vector<8x32xf32>
    %184 = vector.extract_strided_slice %38 {offsets = [0, 16], sizes = [8, 1], strides = [1, 1]} : vector<8x36xf32> to vector<8x1xf32>
    %185 = vector.extract_strided_slice %39 {offsets = [16, 0], sizes = [1, 32], strides = [1, 1]} : vector<36x32xf32> to vector<1x32xf32>
    %186 = vector.broadcast %184 : vector<8x1xf32> to vector<8x32xf32>
    %187 = vector.broadcast %185 : vector<1x32xf32> to vector<8x32xf32>
    %188 = arith.mulf %186, %187 : vector<8x32xf32>
    %189 = vector.extract_strided_slice %40 {offsets = [16, 0], sizes = [1, 32], strides = [1, 1]} : vector<36x32xf32> to vector<1x32xf32>
    %190 = vector.broadcast %189 : vector<1x32xf32> to vector<8x32xf32>
    %191 = arith.addf %188, %190 : vector<8x32xf32>
    %192 = arith.mulf %183, %191 : vector<8x32xf32>
    %193 = vector.extract_strided_slice %38 {offsets = [0, 17], sizes = [8, 1], strides = [1, 1]} : vector<8x36xf32> to vector<8x1xf32>
    %194 = vector.extract_strided_slice %39 {offsets = [17, 0], sizes = [1, 32], strides = [1, 1]} : vector<36x32xf32> to vector<1x32xf32>
    %195 = vector.broadcast %193 : vector<8x1xf32> to vector<8x32xf32>
    %196 = vector.broadcast %194 : vector<1x32xf32> to vector<8x32xf32>
    %197 = arith.mulf %195, %196 : vector<8x32xf32>
    %198 = vector.extract_strided_slice %40 {offsets = [17, 0], sizes = [1, 32], strides = [1, 1]} : vector<36x32xf32> to vector<1x32xf32>
    %199 = vector.broadcast %198 : vector<1x32xf32> to vector<8x32xf32>
    %200 = arith.addf %197, %199 : vector<8x32xf32>
    %201 = arith.mulf %192, %200 : vector<8x32xf32>
    %202 = vector.extract_strided_slice %38 {offsets = [0, 18], sizes = [8, 1], strides = [1, 1]} : vector<8x36xf32> to vector<8x1xf32>
    %203 = vector.extract_strided_slice %39 {offsets = [18, 0], sizes = [1, 32], strides = [1, 1]} : vector<36x32xf32> to vector<1x32xf32>
    %204 = vector.broadcast %202 : vector<8x1xf32> to vector<8x32xf32>
    %205 = vector.broadcast %203 : vector<1x32xf32> to vector<8x32xf32>
    %206 = arith.mulf %204, %205 : vector<8x32xf32>
    %207 = vector.extract_strided_slice %40 {offsets = [18, 0], sizes = [1, 32], strides = [1, 1]} : vector<36x32xf32> to vector<1x32xf32>
    %208 = vector.broadcast %207 : vector<1x32xf32> to vector<8x32xf32>
    %209 = arith.addf %206, %208 : vector<8x32xf32>
    %210 = arith.mulf %201, %209 : vector<8x32xf32>
    %211 = vector.extract_strided_slice %38 {offsets = [0, 19], sizes = [8, 1], strides = [1, 1]} : vector<8x36xf32> to vector<8x1xf32>
    %212 = vector.extract_strided_slice %39 {offsets = [19, 0], sizes = [1, 32], strides = [1, 1]} : vector<36x32xf32> to vector<1x32xf32>
    %213 = vector.broadcast %211 : vector<8x1xf32> to vector<8x32xf32>
    %214 = vector.broadcast %212 : vector<1x32xf32> to vector<8x32xf32>
    %215 = arith.mulf %213, %214 : vector<8x32xf32>
    %216 = vector.extract_strided_slice %40 {offsets = [19, 0], sizes = [1, 32], strides = [1, 1]} : vector<36x32xf32> to vector<1x32xf32>
    %217 = vector.broadcast %216 : vector<1x32xf32> to vector<8x32xf32>
    %218 = arith.addf %215, %217 : vector<8x32xf32>
    %219 = arith.mulf %210, %218 : vector<8x32xf32>
    %220 = vector.extract_strided_slice %38 {offsets = [0, 20], sizes = [8, 1], strides = [1, 1]} : vector<8x36xf32> to vector<8x1xf32>
    %221 = vector.extract_strided_slice %39 {offsets = [20, 0], sizes = [1, 32], strides = [1, 1]} : vector<36x32xf32> to vector<1x32xf32>
    %222 = vector.broadcast %220 : vector<8x1xf32> to vector<8x32xf32>
    %223 = vector.broadcast %221 : vector<1x32xf32> to vector<8x32xf32>
    %224 = arith.mulf %222, %223 : vector<8x32xf32>
    %225 = vector.extract_strided_slice %40 {offsets = [20, 0], sizes = [1, 32], strides = [1, 1]} : vector<36x32xf32> to vector<1x32xf32>
    %226 = vector.broadcast %225 : vector<1x32xf32> to vector<8x32xf32>
    %227 = arith.addf %224, %226 : vector<8x32xf32>
    %228 = arith.mulf %219, %227 : vector<8x32xf32>
    %229 = vector.extract_strided_slice %38 {offsets = [0, 21], sizes = [8, 1], strides = [1, 1]} : vector<8x36xf32> to vector<8x1xf32>
    %230 = vector.extract_strided_slice %39 {offsets = [21, 0], sizes = [1, 32], strides = [1, 1]} : vector<36x32xf32> to vector<1x32xf32>
    %231 = vector.broadcast %229 : vector<8x1xf32> to vector<8x32xf32>
    %232 = vector.broadcast %230 : vector<1x32xf32> to vector<8x32xf32>
    %233 = arith.mulf %231, %232 : vector<8x32xf32>
    %234 = vector.extract_strided_slice %40 {offsets = [21, 0], sizes = [1, 32], strides = [1, 1]} : vector<36x32xf32> to vector<1x32xf32>
    %235 = vector.broadcast %234 : vector<1x32xf32> to vector<8x32xf32>
    %236 = arith.addf %233, %235 : vector<8x32xf32>
    %237 = arith.mulf %228, %236 : vector<8x32xf32>
    %238 = vector.extract_strided_slice %38 {offsets = [0, 22], sizes = [8, 1], strides = [1, 1]} : vector<8x36xf32> to vector<8x1xf32>
    %239 = vector.extract_strided_slice %39 {offsets = [22, 0], sizes = [1, 32], strides = [1, 1]} : vector<36x32xf32> to vector<1x32xf32>
    %240 = vector.broadcast %238 : vector<8x1xf32> to vector<8x32xf32>
    %241 = vector.broadcast %239 : vector<1x32xf32> to vector<8x32xf32>
    %242 = arith.mulf %240, %241 : vector<8x32xf32>
    %243 = vector.extract_strided_slice %40 {offsets = [22, 0], sizes = [1, 32], strides = [1, 1]} : vector<36x32xf32> to vector<1x32xf32>
    %244 = vector.broadcast %243 : vector<1x32xf32> to vector<8x32xf32>
    %245 = arith.addf %242, %244 : vector<8x32xf32>
    %246 = arith.mulf %237, %245 : vector<8x32xf32>
    %247 = vector.extract_strided_slice %38 {offsets = [0, 23], sizes = [8, 1], strides = [1, 1]} : vector<8x36xf32> to vector<8x1xf32>
    %248 = vector.extract_strided_slice %39 {offsets = [23, 0], sizes = [1, 32], strides = [1, 1]} : vector<36x32xf32> to vector<1x32xf32>
    %249 = vector.broadcast %247 : vector<8x1xf32> to vector<8x32xf32>
    %250 = vector.broadcast %248 : vector<1x32xf32> to vector<8x32xf32>
    %251 = arith.mulf %249, %250 : vector<8x32xf32>
    %252 = vector.extract_strided_slice %40 {offsets = [23, 0], sizes = [1, 32], strides = [1, 1]} : vector<36x32xf32> to vector<1x32xf32>
    %253 = vector.broadcast %252 : vector<1x32xf32> to vector<8x32xf32>
    %254 = arith.addf %251, %253 : vector<8x32xf32>
    %255 = arith.mulf %246, %254 : vector<8x32xf32>
    %256 = vector.extract_strided_slice %38 {offsets = [0, 24], sizes = [8, 1], strides = [1, 1]} : vector<8x36xf32> to vector<8x1xf32>
    %257 = vector.extract_strided_slice %39 {offsets = [24, 0], sizes = [1, 32], strides = [1, 1]} : vector<36x32xf32> to vector<1x32xf32>
    %258 = vector.broadcast %256 : vector<8x1xf32> to vector<8x32xf32>
    %259 = vector.broadcast %257 : vector<1x32xf32> to vector<8x32xf32>
    %260 = arith.mulf %258, %259 : vector<8x32xf32>
    %261 = vector.extract_strided_slice %40 {offsets = [24, 0], sizes = [1, 32], strides = [1, 1]} : vector<36x32xf32> to vector<1x32xf32>
    %262 = vector.broadcast %261 : vector<1x32xf32> to vector<8x32xf32>
    %263 = arith.addf %260, %262 : vector<8x32xf32>
    %264 = arith.mulf %255, %263 : vector<8x32xf32>
    %265 = vector.extract_strided_slice %38 {offsets = [0, 25], sizes = [8, 1], strides = [1, 1]} : vector<8x36xf32> to vector<8x1xf32>
    %266 = vector.extract_strided_slice %39 {offsets = [25, 0], sizes = [1, 32], strides = [1, 1]} : vector<36x32xf32> to vector<1x32xf32>
    %267 = vector.broadcast %265 : vector<8x1xf32> to vector<8x32xf32>
    %268 = vector.broadcast %266 : vector<1x32xf32> to vector<8x32xf32>
    %269 = arith.mulf %267, %268 : vector<8x32xf32>
    %270 = vector.extract_strided_slice %40 {offsets = [25, 0], sizes = [1, 32], strides = [1, 1]} : vector<36x32xf32> to vector<1x32xf32>
    %271 = vector.broadcast %270 : vector<1x32xf32> to vector<8x32xf32>
    %272 = arith.addf %269, %271 : vector<8x32xf32>
    %273 = arith.mulf %264, %272 : vector<8x32xf32>
    %274 = vector.extract_strided_slice %38 {offsets = [0, 26], sizes = [8, 1], strides = [1, 1]} : vector<8x36xf32> to vector<8x1xf32>
    %275 = vector.extract_strided_slice %39 {offsets = [26, 0], sizes = [1, 32], strides = [1, 1]} : vector<36x32xf32> to vector<1x32xf32>
    %276 = vector.broadcast %274 : vector<8x1xf32> to vector<8x32xf32>
    %277 = vector.broadcast %275 : vector<1x32xf32> to vector<8x32xf32>
    %278 = arith.mulf %276, %277 : vector<8x32xf32>
    %279 = vector.extract_strided_slice %40 {offsets = [26, 0], sizes = [1, 32], strides = [1, 1]} : vector<36x32xf32> to vector<1x32xf32>
    %280 = vector.broadcast %279 : vector<1x32xf32> to vector<8x32xf32>
    %281 = arith.addf %278, %280 : vector<8x32xf32>
    %282 = arith.mulf %273, %281 : vector<8x32xf32>
    %283 = vector.extract_strided_slice %38 {offsets = [0, 27], sizes = [8, 1], strides = [1, 1]} : vector<8x36xf32> to vector<8x1xf32>
    %284 = vector.extract_strided_slice %39 {offsets = [27, 0], sizes = [1, 32], strides = [1, 1]} : vector<36x32xf32> to vector<1x32xf32>
    %285 = vector.broadcast %283 : vector<8x1xf32> to vector<8x32xf32>
    %286 = vector.broadcast %284 : vector<1x32xf32> to vector<8x32xf32>
    %287 = arith.mulf %285, %286 : vector<8x32xf32>
    %288 = vector.extract_strided_slice %40 {offsets = [27, 0], sizes = [1, 32], strides = [1, 1]} : vector<36x32xf32> to vector<1x32xf32>
    %289 = vector.broadcast %288 : vector<1x32xf32> to vector<8x32xf32>
    %290 = arith.addf %287, %289 : vector<8x32xf32>
    %291 = arith.mulf %282, %290 : vector<8x32xf32>
    %292 = vector.extract_strided_slice %38 {offsets = [0, 28], sizes = [8, 1], strides = [1, 1]} : vector<8x36xf32> to vector<8x1xf32>
    %293 = vector.extract_strided_slice %39 {offsets = [28, 0], sizes = [1, 32], strides = [1, 1]} : vector<36x32xf32> to vector<1x32xf32>
    %294 = vector.broadcast %292 : vector<8x1xf32> to vector<8x32xf32>
    %295 = vector.broadcast %293 : vector<1x32xf32> to vector<8x32xf32>
    %296 = arith.mulf %294, %295 : vector<8x32xf32>
    %297 = vector.extract_strided_slice %40 {offsets = [28, 0], sizes = [1, 32], strides = [1, 1]} : vector<36x32xf32> to vector<1x32xf32>
    %298 = vector.broadcast %297 : vector<1x32xf32> to vector<8x32xf32>
    %299 = arith.addf %296, %298 : vector<8x32xf32>
    %300 = arith.mulf %291, %299 : vector<8x32xf32>
    %301 = vector.extract_strided_slice %38 {offsets = [0, 29], sizes = [8, 1], strides = [1, 1]} : vector<8x36xf32> to vector<8x1xf32>
    %302 = vector.extract_strided_slice %39 {offsets = [29, 0], sizes = [1, 32], strides = [1, 1]} : vector<36x32xf32> to vector<1x32xf32>
    %303 = vector.broadcast %301 : vector<8x1xf32> to vector<8x32xf32>
    %304 = vector.broadcast %302 : vector<1x32xf32> to vector<8x32xf32>
    %305 = arith.mulf %303, %304 : vector<8x32xf32>
    %306 = vector.extract_strided_slice %40 {offsets = [29, 0], sizes = [1, 32], strides = [1, 1]} : vector<36x32xf32> to vector<1x32xf32>
    %307 = vector.broadcast %306 : vector<1x32xf32> to vector<8x32xf32>
    %308 = arith.addf %305, %307 : vector<8x32xf32>
    %309 = arith.mulf %300, %308 : vector<8x32xf32>
    %310 = vector.extract_strided_slice %38 {offsets = [0, 30], sizes = [8, 1], strides = [1, 1]} : vector<8x36xf32> to vector<8x1xf32>
    %311 = vector.extract_strided_slice %39 {offsets = [30, 0], sizes = [1, 32], strides = [1, 1]} : vector<36x32xf32> to vector<1x32xf32>
    %312 = vector.broadcast %310 : vector<8x1xf32> to vector<8x32xf32>
    %313 = vector.broadcast %311 : vector<1x32xf32> to vector<8x32xf32>
    %314 = arith.mulf %312, %313 : vector<8x32xf32>
    %315 = vector.extract_strided_slice %40 {offsets = [30, 0], sizes = [1, 32], strides = [1, 1]} : vector<36x32xf32> to vector<1x32xf32>
    %316 = vector.broadcast %315 : vector<1x32xf32> to vector<8x32xf32>
    %317 = arith.addf %314, %316 : vector<8x32xf32>
    %318 = arith.mulf %309, %317 : vector<8x32xf32>
    %319 = vector.extract_strided_slice %38 {offsets = [0, 31], sizes = [8, 1], strides = [1, 1]} : vector<8x36xf32> to vector<8x1xf32>
    %320 = vector.extract_strided_slice %39 {offsets = [31, 0], sizes = [1, 32], strides = [1, 1]} : vector<36x32xf32> to vector<1x32xf32>
    %321 = vector.broadcast %319 : vector<8x1xf32> to vector<8x32xf32>
    %322 = vector.broadcast %320 : vector<1x32xf32> to vector<8x32xf32>
    %323 = arith.mulf %321, %322 : vector<8x32xf32>
    %324 = vector.extract_strided_slice %40 {offsets = [31, 0], sizes = [1, 32], strides = [1, 1]} : vector<36x32xf32> to vector<1x32xf32>
    %325 = vector.broadcast %324 : vector<1x32xf32> to vector<8x32xf32>
    %326 = arith.addf %323, %325 : vector<8x32xf32>
    %327 = arith.mulf %318, %326 : vector<8x32xf32>
    %cst_15 = arith.constant 1.000000e-30 : f32
    %328 = vector.broadcast %cst_15 : f32 to vector<8x32xf32>
    %329 = arith.maximumf %327, %328 : vector<8x32xf32>
    %330 = math.log %329 : vector<8x32xf32>
    %331 = vector.extract_strided_slice %38 {offsets = [0, 32], sizes = [8, 1], strides = [1, 1]} : vector<8x36xf32> to vector<8x1xf32>
    %332 = vector.extract_strided_slice %39 {offsets = [32, 0], sizes = [1, 32], strides = [1, 1]} : vector<36x32xf32> to vector<1x32xf32>
    %333 = vector.broadcast %331 : vector<8x1xf32> to vector<8x32xf32>
    %334 = vector.broadcast %332 : vector<1x32xf32> to vector<8x32xf32>
    %335 = arith.mulf %333, %334 : vector<8x32xf32>
    %336 = vector.extract_strided_slice %40 {offsets = [32, 0], sizes = [1, 32], strides = [1, 1]} : vector<36x32xf32> to vector<1x32xf32>
    %337 = vector.broadcast %336 : vector<1x32xf32> to vector<8x32xf32>
    %338 = arith.addf %335, %337 : vector<8x32xf32>
    %339 = vector.extract_strided_slice %38 {offsets = [0, 33], sizes = [8, 1], strides = [1, 1]} : vector<8x36xf32> to vector<8x1xf32>
    %340 = vector.extract_strided_slice %39 {offsets = [33, 0], sizes = [1, 32], strides = [1, 1]} : vector<36x32xf32> to vector<1x32xf32>
    %341 = vector.broadcast %339 : vector<8x1xf32> to vector<8x32xf32>
    %342 = vector.broadcast %340 : vector<1x32xf32> to vector<8x32xf32>
    %343 = arith.mulf %341, %342 : vector<8x32xf32>
    %344 = vector.extract_strided_slice %40 {offsets = [33, 0], sizes = [1, 32], strides = [1, 1]} : vector<36x32xf32> to vector<1x32xf32>
    %345 = vector.broadcast %344 : vector<1x32xf32> to vector<8x32xf32>
    %346 = arith.addf %343, %345 : vector<8x32xf32>
    %347 = arith.mulf %338, %346 : vector<8x32xf32>
    %348 = vector.extract_strided_slice %38 {offsets = [0, 34], sizes = [8, 1], strides = [1, 1]} : vector<8x36xf32> to vector<8x1xf32>
    %349 = vector.extract_strided_slice %39 {offsets = [34, 0], sizes = [1, 32], strides = [1, 1]} : vector<36x32xf32> to vector<1x32xf32>
    %350 = vector.broadcast %348 : vector<8x1xf32> to vector<8x32xf32>
    %351 = vector.broadcast %349 : vector<1x32xf32> to vector<8x32xf32>
    %352 = arith.mulf %350, %351 : vector<8x32xf32>
    %353 = vector.extract_strided_slice %40 {offsets = [34, 0], sizes = [1, 32], strides = [1, 1]} : vector<36x32xf32> to vector<1x32xf32>
    %354 = vector.broadcast %353 : vector<1x32xf32> to vector<8x32xf32>
    %355 = arith.addf %352, %354 : vector<8x32xf32>
    %356 = arith.mulf %347, %355 : vector<8x32xf32>
    %357 = vector.extract_strided_slice %38 {offsets = [0, 35], sizes = [8, 1], strides = [1, 1]} : vector<8x36xf32> to vector<8x1xf32>
    %358 = vector.extract_strided_slice %39 {offsets = [35, 0], sizes = [1, 32], strides = [1, 1]} : vector<36x32xf32> to vector<1x32xf32>
    %359 = vector.broadcast %357 : vector<8x1xf32> to vector<8x32xf32>
    %360 = vector.broadcast %358 : vector<1x32xf32> to vector<8x32xf32>
    %361 = arith.mulf %359, %360 : vector<8x32xf32>
    %362 = vector.extract_strided_slice %40 {offsets = [35, 0], sizes = [1, 32], strides = [1, 1]} : vector<36x32xf32> to vector<1x32xf32>
    %363 = vector.broadcast %362 : vector<1x32xf32> to vector<8x32xf32>
    %364 = arith.addf %361, %363 : vector<8x32xf32>
    %365 = arith.mulf %356, %364 : vector<8x32xf32>
    %cst_16 = arith.constant 1.000000e-30 : f32
    %366 = vector.broadcast %cst_16 : f32 to vector<8x32xf32>
    %367 = arith.maximumf %365, %366 : vector<8x32xf32>
    %368 = math.log %367 : vector<8x32xf32>
    %369 = arith.addf %330, %368 : vector<8x32xf32>
    %cst_17 = arith.constant 1.000000e+00 : f32
    %370 = vector.broadcast %cst_17 : f32 to vector<8x32xf32>
    %371 = arith.subf %370, %369 : vector<8x32xf32>
    %372 = tpu.reciprocal %371 {approx = true} : vector<8x32xf32> -> vector<8x32xf32>
    %373 = tpu.iota {dimensions = array<i32: 1>} : vector<8x32xi32>
    %c16_i32 = arith.constant 16 : i32
    %374 = vector.broadcast %c16_i32 : i32 to vector<8x32xi32>
    %375 = arith.cmpi slt, %373, %374 : vector<8x32xi32>
    %cst_18 = arith.constant 1.000000e+00 : f32
    %376 = vector.broadcast %cst_18 : f32 to vector<8x32xf32>
    %377 = arith.subf %376, %372 : vector<8x32xf32>
    %378 = arith.select %375, %372, %377 : vector<8x32xi1>, vector<8x32xf32>
    %c0_19 = arith.constant 0 : index
    %c0_20 = arith.constant 0 : index
    %379 = vector.load %arg8[%c0_19, %c0_20] : memref<32x32xf32, #tpu.memory_space<vmem>>, vector<32x32xf32>
    %c0_21 = arith.constant 0 : index
    %c0_22 = arith.constant 0 : index
    %380 = vector.load %arg9[%c0_21, %c0_22] : memref<32x32xf32, #tpu.memory_space<vmem>>, vector<32x32xf32>
    %381 = vector.extract_strided_slice %378 {offsets = [0, 0], sizes = [8, 1], strides = [1, 1]} : vector<8x32xf32> to vector<8x1xf32>
    %382 = vector.extract_strided_slice %379 {offsets = [0, 0], sizes = [1, 32], strides = [1, 1]} : vector<32x32xf32> to vector<1x32xf32>
    %383 = vector.broadcast %381 : vector<8x1xf32> to vector<8x32xf32>
    %384 = vector.broadcast %382 : vector<1x32xf32> to vector<8x32xf32>
    %385 = arith.mulf %383, %384 : vector<8x32xf32>
    %386 = vector.extract_strided_slice %380 {offsets = [0, 0], sizes = [1, 32], strides = [1, 1]} : vector<32x32xf32> to vector<1x32xf32>
    %387 = vector.broadcast %386 : vector<1x32xf32> to vector<8x32xf32>
    %388 = arith.addf %385, %387 : vector<8x32xf32>
    %389 = vector.extract_strided_slice %378 {offsets = [0, 1], sizes = [8, 1], strides = [1, 1]} : vector<8x32xf32> to vector<8x1xf32>
    %390 = vector.extract_strided_slice %379 {offsets = [1, 0], sizes = [1, 32], strides = [1, 1]} : vector<32x32xf32> to vector<1x32xf32>
    %391 = vector.broadcast %389 : vector<8x1xf32> to vector<8x32xf32>
    %392 = vector.broadcast %390 : vector<1x32xf32> to vector<8x32xf32>
    %393 = arith.mulf %391, %392 : vector<8x32xf32>
    %394 = vector.extract_strided_slice %380 {offsets = [1, 0], sizes = [1, 32], strides = [1, 1]} : vector<32x32xf32> to vector<1x32xf32>
    %395 = vector.broadcast %394 : vector<1x32xf32> to vector<8x32xf32>
    %396 = arith.addf %393, %395 : vector<8x32xf32>
    %397 = arith.mulf %388, %396 : vector<8x32xf32>
    %398 = vector.extract_strided_slice %378 {offsets = [0, 2], sizes = [8, 1], strides = [1, 1]} : vector<8x32xf32> to vector<8x1xf32>
    %399 = vector.extract_strided_slice %379 {offsets = [2, 0], sizes = [1, 32], strides = [1, 1]} : vector<32x32xf32> to vector<1x32xf32>
    %400 = vector.broadcast %398 : vector<8x1xf32> to vector<8x32xf32>
    %401 = vector.broadcast %399 : vector<1x32xf32> to vector<8x32xf32>
    %402 = arith.mulf %400, %401 : vector<8x32xf32>
    %403 = vector.extract_strided_slice %380 {offsets = [2, 0], sizes = [1, 32], strides = [1, 1]} : vector<32x32xf32> to vector<1x32xf32>
    %404 = vector.broadcast %403 : vector<1x32xf32> to vector<8x32xf32>
    %405 = arith.addf %402, %404 : vector<8x32xf32>
    %406 = arith.mulf %397, %405 : vector<8x32xf32>
    %407 = vector.extract_strided_slice %378 {offsets = [0, 3], sizes = [8, 1], strides = [1, 1]} : vector<8x32xf32> to vector<8x1xf32>
    %408 = vector.extract_strided_slice %379 {offsets = [3, 0], sizes = [1, 32], strides = [1, 1]} : vector<32x32xf32> to vector<1x32xf32>
    %409 = vector.broadcast %407 : vector<8x1xf32> to vector<8x32xf32>
    %410 = vector.broadcast %408 : vector<1x32xf32> to vector<8x32xf32>
    %411 = arith.mulf %409, %410 : vector<8x32xf32>
    %412 = vector.extract_strided_slice %380 {offsets = [3, 0], sizes = [1, 32], strides = [1, 1]} : vector<32x32xf32> to vector<1x32xf32>
    %413 = vector.broadcast %412 : vector<1x32xf32> to vector<8x32xf32>
    %414 = arith.addf %411, %413 : vector<8x32xf32>
    %415 = arith.mulf %406, %414 : vector<8x32xf32>
    %416 = vector.extract_strided_slice %378 {offsets = [0, 4], sizes = [8, 1], strides = [1, 1]} : vector<8x32xf32> to vector<8x1xf32>
    %417 = vector.extract_strided_slice %379 {offsets = [4, 0], sizes = [1, 32], strides = [1, 1]} : vector<32x32xf32> to vector<1x32xf32>
    %418 = vector.broadcast %416 : vector<8x1xf32> to vector<8x32xf32>
    %419 = vector.broadcast %417 : vector<1x32xf32> to vector<8x32xf32>
    %420 = arith.mulf %418, %419 : vector<8x32xf32>
    %421 = vector.extract_strided_slice %380 {offsets = [4, 0], sizes = [1, 32], strides = [1, 1]} : vector<32x32xf32> to vector<1x32xf32>
    %422 = vector.broadcast %421 : vector<1x32xf32> to vector<8x32xf32>
    %423 = arith.addf %420, %422 : vector<8x32xf32>
    %424 = arith.mulf %415, %423 : vector<8x32xf32>
    %425 = vector.extract_strided_slice %378 {offsets = [0, 5], sizes = [8, 1], strides = [1, 1]} : vector<8x32xf32> to vector<8x1xf32>
    %426 = vector.extract_strided_slice %379 {offsets = [5, 0], sizes = [1, 32], strides = [1, 1]} : vector<32x32xf32> to vector<1x32xf32>
    %427 = vector.broadcast %425 : vector<8x1xf32> to vector<8x32xf32>
    %428 = vector.broadcast %426 : vector<1x32xf32> to vector<8x32xf32>
    %429 = arith.mulf %427, %428 : vector<8x32xf32>
    %430 = vector.extract_strided_slice %380 {offsets = [5, 0], sizes = [1, 32], strides = [1, 1]} : vector<32x32xf32> to vector<1x32xf32>
    %431 = vector.broadcast %430 : vector<1x32xf32> to vector<8x32xf32>
    %432 = arith.addf %429, %431 : vector<8x32xf32>
    %433 = arith.mulf %424, %432 : vector<8x32xf32>
    %434 = vector.extract_strided_slice %378 {offsets = [0, 6], sizes = [8, 1], strides = [1, 1]} : vector<8x32xf32> to vector<8x1xf32>
    %435 = vector.extract_strided_slice %379 {offsets = [6, 0], sizes = [1, 32], strides = [1, 1]} : vector<32x32xf32> to vector<1x32xf32>
    %436 = vector.broadcast %434 : vector<8x1xf32> to vector<8x32xf32>
    %437 = vector.broadcast %435 : vector<1x32xf32> to vector<8x32xf32>
    %438 = arith.mulf %436, %437 : vector<8x32xf32>
    %439 = vector.extract_strided_slice %380 {offsets = [6, 0], sizes = [1, 32], strides = [1, 1]} : vector<32x32xf32> to vector<1x32xf32>
    %440 = vector.broadcast %439 : vector<1x32xf32> to vector<8x32xf32>
    %441 = arith.addf %438, %440 : vector<8x32xf32>
    %442 = arith.mulf %433, %441 : vector<8x32xf32>
    %443 = vector.extract_strided_slice %378 {offsets = [0, 7], sizes = [8, 1], strides = [1, 1]} : vector<8x32xf32> to vector<8x1xf32>
    %444 = vector.extract_strided_slice %379 {offsets = [7, 0], sizes = [1, 32], strides = [1, 1]} : vector<32x32xf32> to vector<1x32xf32>
    %445 = vector.broadcast %443 : vector<8x1xf32> to vector<8x32xf32>
    %446 = vector.broadcast %444 : vector<1x32xf32> to vector<8x32xf32>
    %447 = arith.mulf %445, %446 : vector<8x32xf32>
    %448 = vector.extract_strided_slice %380 {offsets = [7, 0], sizes = [1, 32], strides = [1, 1]} : vector<32x32xf32> to vector<1x32xf32>
    %449 = vector.broadcast %448 : vector<1x32xf32> to vector<8x32xf32>
    %450 = arith.addf %447, %449 : vector<8x32xf32>
    %451 = arith.mulf %442, %450 : vector<8x32xf32>
    %452 = vector.extract_strided_slice %378 {offsets = [0, 8], sizes = [8, 1], strides = [1, 1]} : vector<8x32xf32> to vector<8x1xf32>
    %453 = vector.extract_strided_slice %379 {offsets = [8, 0], sizes = [1, 32], strides = [1, 1]} : vector<32x32xf32> to vector<1x32xf32>
    %454 = vector.broadcast %452 : vector<8x1xf32> to vector<8x32xf32>
    %455 = vector.broadcast %453 : vector<1x32xf32> to vector<8x32xf32>
    %456 = arith.mulf %454, %455 : vector<8x32xf32>
    %457 = vector.extract_strided_slice %380 {offsets = [8, 0], sizes = [1, 32], strides = [1, 1]} : vector<32x32xf32> to vector<1x32xf32>
    %458 = vector.broadcast %457 : vector<1x32xf32> to vector<8x32xf32>
    %459 = arith.addf %456, %458 : vector<8x32xf32>
    %460 = arith.mulf %451, %459 : vector<8x32xf32>
    %461 = vector.extract_strided_slice %378 {offsets = [0, 9], sizes = [8, 1], strides = [1, 1]} : vector<8x32xf32> to vector<8x1xf32>
    %462 = vector.extract_strided_slice %379 {offsets = [9, 0], sizes = [1, 32], strides = [1, 1]} : vector<32x32xf32> to vector<1x32xf32>
    %463 = vector.broadcast %461 : vector<8x1xf32> to vector<8x32xf32>
    %464 = vector.broadcast %462 : vector<1x32xf32> to vector<8x32xf32>
    %465 = arith.mulf %463, %464 : vector<8x32xf32>
    %466 = vector.extract_strided_slice %380 {offsets = [9, 0], sizes = [1, 32], strides = [1, 1]} : vector<32x32xf32> to vector<1x32xf32>
    %467 = vector.broadcast %466 : vector<1x32xf32> to vector<8x32xf32>
    %468 = arith.addf %465, %467 : vector<8x32xf32>
    %469 = arith.mulf %460, %468 : vector<8x32xf32>
    %470 = vector.extract_strided_slice %378 {offsets = [0, 10], sizes = [8, 1], strides = [1, 1]} : vector<8x32xf32> to vector<8x1xf32>
    %471 = vector.extract_strided_slice %379 {offsets = [10, 0], sizes = [1, 32], strides = [1, 1]} : vector<32x32xf32> to vector<1x32xf32>
    %472 = vector.broadcast %470 : vector<8x1xf32> to vector<8x32xf32>
    %473 = vector.broadcast %471 : vector<1x32xf32> to vector<8x32xf32>
    %474 = arith.mulf %472, %473 : vector<8x32xf32>
    %475 = vector.extract_strided_slice %380 {offsets = [10, 0], sizes = [1, 32], strides = [1, 1]} : vector<32x32xf32> to vector<1x32xf32>
    %476 = vector.broadcast %475 : vector<1x32xf32> to vector<8x32xf32>
    %477 = arith.addf %474, %476 : vector<8x32xf32>
    %478 = arith.mulf %469, %477 : vector<8x32xf32>
    %479 = vector.extract_strided_slice %378 {offsets = [0, 11], sizes = [8, 1], strides = [1, 1]} : vector<8x32xf32> to vector<8x1xf32>
    %480 = vector.extract_strided_slice %379 {offsets = [11, 0], sizes = [1, 32], strides = [1, 1]} : vector<32x32xf32> to vector<1x32xf32>
    %481 = vector.broadcast %479 : vector<8x1xf32> to vector<8x32xf32>
    %482 = vector.broadcast %480 : vector<1x32xf32> to vector<8x32xf32>
    %483 = arith.mulf %481, %482 : vector<8x32xf32>
    %484 = vector.extract_strided_slice %380 {offsets = [11, 0], sizes = [1, 32], strides = [1, 1]} : vector<32x32xf32> to vector<1x32xf32>
    %485 = vector.broadcast %484 : vector<1x32xf32> to vector<8x32xf32>
    %486 = arith.addf %483, %485 : vector<8x32xf32>
    %487 = arith.mulf %478, %486 : vector<8x32xf32>
    %488 = vector.extract_strided_slice %378 {offsets = [0, 12], sizes = [8, 1], strides = [1, 1]} : vector<8x32xf32> to vector<8x1xf32>
    %489 = vector.extract_strided_slice %379 {offsets = [12, 0], sizes = [1, 32], strides = [1, 1]} : vector<32x32xf32> to vector<1x32xf32>
    %490 = vector.broadcast %488 : vector<8x1xf32> to vector<8x32xf32>
    %491 = vector.broadcast %489 : vector<1x32xf32> to vector<8x32xf32>
    %492 = arith.mulf %490, %491 : vector<8x32xf32>
    %493 = vector.extract_strided_slice %380 {offsets = [12, 0], sizes = [1, 32], strides = [1, 1]} : vector<32x32xf32> to vector<1x32xf32>
    %494 = vector.broadcast %493 : vector<1x32xf32> to vector<8x32xf32>
    %495 = arith.addf %492, %494 : vector<8x32xf32>
    %496 = arith.mulf %487, %495 : vector<8x32xf32>
    %497 = vector.extract_strided_slice %378 {offsets = [0, 13], sizes = [8, 1], strides = [1, 1]} : vector<8x32xf32> to vector<8x1xf32>
    %498 = vector.extract_strided_slice %379 {offsets = [13, 0], sizes = [1, 32], strides = [1, 1]} : vector<32x32xf32> to vector<1x32xf32>
    %499 = vector.broadcast %497 : vector<8x1xf32> to vector<8x32xf32>
    %500 = vector.broadcast %498 : vector<1x32xf32> to vector<8x32xf32>
    %501 = arith.mulf %499, %500 : vector<8x32xf32>
    %502 = vector.extract_strided_slice %380 {offsets = [13, 0], sizes = [1, 32], strides = [1, 1]} : vector<32x32xf32> to vector<1x32xf32>
    %503 = vector.broadcast %502 : vector<1x32xf32> to vector<8x32xf32>
    %504 = arith.addf %501, %503 : vector<8x32xf32>
    %505 = arith.mulf %496, %504 : vector<8x32xf32>
    %506 = vector.extract_strided_slice %378 {offsets = [0, 14], sizes = [8, 1], strides = [1, 1]} : vector<8x32xf32> to vector<8x1xf32>
    %507 = vector.extract_strided_slice %379 {offsets = [14, 0], sizes = [1, 32], strides = [1, 1]} : vector<32x32xf32> to vector<1x32xf32>
    %508 = vector.broadcast %506 : vector<8x1xf32> to vector<8x32xf32>
    %509 = vector.broadcast %507 : vector<1x32xf32> to vector<8x32xf32>
    %510 = arith.mulf %508, %509 : vector<8x32xf32>
    %511 = vector.extract_strided_slice %380 {offsets = [14, 0], sizes = [1, 32], strides = [1, 1]} : vector<32x32xf32> to vector<1x32xf32>
    %512 = vector.broadcast %511 : vector<1x32xf32> to vector<8x32xf32>
    %513 = arith.addf %510, %512 : vector<8x32xf32>
    %514 = arith.mulf %505, %513 : vector<8x32xf32>
    %515 = vector.extract_strided_slice %378 {offsets = [0, 15], sizes = [8, 1], strides = [1, 1]} : vector<8x32xf32> to vector<8x1xf32>
    %516 = vector.extract_strided_slice %379 {offsets = [15, 0], sizes = [1, 32], strides = [1, 1]} : vector<32x32xf32> to vector<1x32xf32>
    %517 = vector.broadcast %515 : vector<8x1xf32> to vector<8x32xf32>
    %518 = vector.broadcast %516 : vector<1x32xf32> to vector<8x32xf32>
    %519 = arith.mulf %517, %518 : vector<8x32xf32>
    %520 = vector.extract_strided_slice %380 {offsets = [15, 0], sizes = [1, 32], strides = [1, 1]} : vector<32x32xf32> to vector<1x32xf32>
    %521 = vector.broadcast %520 : vector<1x32xf32> to vector<8x32xf32>
    %522 = arith.addf %519, %521 : vector<8x32xf32>
    %523 = arith.mulf %514, %522 : vector<8x32xf32>
    %524 = vector.extract_strided_slice %378 {offsets = [0, 16], sizes = [8, 1], strides = [1, 1]} : vector<8x32xf32> to vector<8x1xf32>
    %525 = vector.extract_strided_slice %379 {offsets = [16, 0], sizes = [1, 32], strides = [1, 1]} : vector<32x32xf32> to vector<1x32xf32>
    %526 = vector.broadcast %524 : vector<8x1xf32> to vector<8x32xf32>
    %527 = vector.broadcast %525 : vector<1x32xf32> to vector<8x32xf32>
    %528 = arith.mulf %526, %527 : vector<8x32xf32>
    %529 = vector.extract_strided_slice %380 {offsets = [16, 0], sizes = [1, 32], strides = [1, 1]} : vector<32x32xf32> to vector<1x32xf32>
    %530 = vector.broadcast %529 : vector<1x32xf32> to vector<8x32xf32>
    %531 = arith.addf %528, %530 : vector<8x32xf32>
    %532 = arith.mulf %523, %531 : vector<8x32xf32>
    %533 = vector.extract_strided_slice %378 {offsets = [0, 17], sizes = [8, 1], strides = [1, 1]} : vector<8x32xf32> to vector<8x1xf32>
    %534 = vector.extract_strided_slice %379 {offsets = [17, 0], sizes = [1, 32], strides = [1, 1]} : vector<32x32xf32> to vector<1x32xf32>
    %535 = vector.broadcast %533 : vector<8x1xf32> to vector<8x32xf32>
    %536 = vector.broadcast %534 : vector<1x32xf32> to vector<8x32xf32>
    %537 = arith.mulf %535, %536 : vector<8x32xf32>
    %538 = vector.extract_strided_slice %380 {offsets = [17, 0], sizes = [1, 32], strides = [1, 1]} : vector<32x32xf32> to vector<1x32xf32>
    %539 = vector.broadcast %538 : vector<1x32xf32> to vector<8x32xf32>
    %540 = arith.addf %537, %539 : vector<8x32xf32>
    %541 = arith.mulf %532, %540 : vector<8x32xf32>
    %542 = vector.extract_strided_slice %378 {offsets = [0, 18], sizes = [8, 1], strides = [1, 1]} : vector<8x32xf32> to vector<8x1xf32>
    %543 = vector.extract_strided_slice %379 {offsets = [18, 0], sizes = [1, 32], strides = [1, 1]} : vector<32x32xf32> to vector<1x32xf32>
    %544 = vector.broadcast %542 : vector<8x1xf32> to vector<8x32xf32>
    %545 = vector.broadcast %543 : vector<1x32xf32> to vector<8x32xf32>
    %546 = arith.mulf %544, %545 : vector<8x32xf32>
    %547 = vector.extract_strided_slice %380 {offsets = [18, 0], sizes = [1, 32], strides = [1, 1]} : vector<32x32xf32> to vector<1x32xf32>
    %548 = vector.broadcast %547 : vector<1x32xf32> to vector<8x32xf32>
    %549 = arith.addf %546, %548 : vector<8x32xf32>
    %550 = arith.mulf %541, %549 : vector<8x32xf32>
    %551 = vector.extract_strided_slice %378 {offsets = [0, 19], sizes = [8, 1], strides = [1, 1]} : vector<8x32xf32> to vector<8x1xf32>
    %552 = vector.extract_strided_slice %379 {offsets = [19, 0], sizes = [1, 32], strides = [1, 1]} : vector<32x32xf32> to vector<1x32xf32>
    %553 = vector.broadcast %551 : vector<8x1xf32> to vector<8x32xf32>
    %554 = vector.broadcast %552 : vector<1x32xf32> to vector<8x32xf32>
    %555 = arith.mulf %553, %554 : vector<8x32xf32>
    %556 = vector.extract_strided_slice %380 {offsets = [19, 0], sizes = [1, 32], strides = [1, 1]} : vector<32x32xf32> to vector<1x32xf32>
    %557 = vector.broadcast %556 : vector<1x32xf32> to vector<8x32xf32>
    %558 = arith.addf %555, %557 : vector<8x32xf32>
    %559 = arith.mulf %550, %558 : vector<8x32xf32>
    %560 = vector.extract_strided_slice %378 {offsets = [0, 20], sizes = [8, 1], strides = [1, 1]} : vector<8x32xf32> to vector<8x1xf32>
    %561 = vector.extract_strided_slice %379 {offsets = [20, 0], sizes = [1, 32], strides = [1, 1]} : vector<32x32xf32> to vector<1x32xf32>
    %562 = vector.broadcast %560 : vector<8x1xf32> to vector<8x32xf32>
    %563 = vector.broadcast %561 : vector<1x32xf32> to vector<8x32xf32>
    %564 = arith.mulf %562, %563 : vector<8x32xf32>
    %565 = vector.extract_strided_slice %380 {offsets = [20, 0], sizes = [1, 32], strides = [1, 1]} : vector<32x32xf32> to vector<1x32xf32>
    %566 = vector.broadcast %565 : vector<1x32xf32> to vector<8x32xf32>
    %567 = arith.addf %564, %566 : vector<8x32xf32>
    %568 = arith.mulf %559, %567 : vector<8x32xf32>
    %569 = vector.extract_strided_slice %378 {offsets = [0, 21], sizes = [8, 1], strides = [1, 1]} : vector<8x32xf32> to vector<8x1xf32>
    %570 = vector.extract_strided_slice %379 {offsets = [21, 0], sizes = [1, 32], strides = [1, 1]} : vector<32x32xf32> to vector<1x32xf32>
    %571 = vector.broadcast %569 : vector<8x1xf32> to vector<8x32xf32>
    %572 = vector.broadcast %570 : vector<1x32xf32> to vector<8x32xf32>
    %573 = arith.mulf %571, %572 : vector<8x32xf32>
    %574 = vector.extract_strided_slice %380 {offsets = [21, 0], sizes = [1, 32], strides = [1, 1]} : vector<32x32xf32> to vector<1x32xf32>
    %575 = vector.broadcast %574 : vector<1x32xf32> to vector<8x32xf32>
    %576 = arith.addf %573, %575 : vector<8x32xf32>
    %577 = arith.mulf %568, %576 : vector<8x32xf32>
    %578 = vector.extract_strided_slice %378 {offsets = [0, 22], sizes = [8, 1], strides = [1, 1]} : vector<8x32xf32> to vector<8x1xf32>
    %579 = vector.extract_strided_slice %379 {offsets = [22, 0], sizes = [1, 32], strides = [1, 1]} : vector<32x32xf32> to vector<1x32xf32>
    %580 = vector.broadcast %578 : vector<8x1xf32> to vector<8x32xf32>
    %581 = vector.broadcast %579 : vector<1x32xf32> to vector<8x32xf32>
    %582 = arith.mulf %580, %581 : vector<8x32xf32>
    %583 = vector.extract_strided_slice %380 {offsets = [22, 0], sizes = [1, 32], strides = [1, 1]} : vector<32x32xf32> to vector<1x32xf32>
    %584 = vector.broadcast %583 : vector<1x32xf32> to vector<8x32xf32>
    %585 = arith.addf %582, %584 : vector<8x32xf32>
    %586 = arith.mulf %577, %585 : vector<8x32xf32>
    %587 = vector.extract_strided_slice %378 {offsets = [0, 23], sizes = [8, 1], strides = [1, 1]} : vector<8x32xf32> to vector<8x1xf32>
    %588 = vector.extract_strided_slice %379 {offsets = [23, 0], sizes = [1, 32], strides = [1, 1]} : vector<32x32xf32> to vector<1x32xf32>
    %589 = vector.broadcast %587 : vector<8x1xf32> to vector<8x32xf32>
    %590 = vector.broadcast %588 : vector<1x32xf32> to vector<8x32xf32>
    %591 = arith.mulf %589, %590 : vector<8x32xf32>
    %592 = vector.extract_strided_slice %380 {offsets = [23, 0], sizes = [1, 32], strides = [1, 1]} : vector<32x32xf32> to vector<1x32xf32>
    %593 = vector.broadcast %592 : vector<1x32xf32> to vector<8x32xf32>
    %594 = arith.addf %591, %593 : vector<8x32xf32>
    %595 = arith.mulf %586, %594 : vector<8x32xf32>
    %596 = vector.extract_strided_slice %378 {offsets = [0, 24], sizes = [8, 1], strides = [1, 1]} : vector<8x32xf32> to vector<8x1xf32>
    %597 = vector.extract_strided_slice %379 {offsets = [24, 0], sizes = [1, 32], strides = [1, 1]} : vector<32x32xf32> to vector<1x32xf32>
    %598 = vector.broadcast %596 : vector<8x1xf32> to vector<8x32xf32>
    %599 = vector.broadcast %597 : vector<1x32xf32> to vector<8x32xf32>
    %600 = arith.mulf %598, %599 : vector<8x32xf32>
    %601 = vector.extract_strided_slice %380 {offsets = [24, 0], sizes = [1, 32], strides = [1, 1]} : vector<32x32xf32> to vector<1x32xf32>
    %602 = vector.broadcast %601 : vector<1x32xf32> to vector<8x32xf32>
    %603 = arith.addf %600, %602 : vector<8x32xf32>
    %604 = arith.mulf %595, %603 : vector<8x32xf32>
    %605 = vector.extract_strided_slice %378 {offsets = [0, 25], sizes = [8, 1], strides = [1, 1]} : vector<8x32xf32> to vector<8x1xf32>
    %606 = vector.extract_strided_slice %379 {offsets = [25, 0], sizes = [1, 32], strides = [1, 1]} : vector<32x32xf32> to vector<1x32xf32>
    %607 = vector.broadcast %605 : vector<8x1xf32> to vector<8x32xf32>
    %608 = vector.broadcast %606 : vector<1x32xf32> to vector<8x32xf32>
    %609 = arith.mulf %607, %608 : vector<8x32xf32>
    %610 = vector.extract_strided_slice %380 {offsets = [25, 0], sizes = [1, 32], strides = [1, 1]} : vector<32x32xf32> to vector<1x32xf32>
    %611 = vector.broadcast %610 : vector<1x32xf32> to vector<8x32xf32>
    %612 = arith.addf %609, %611 : vector<8x32xf32>
    %613 = arith.mulf %604, %612 : vector<8x32xf32>
    %614 = vector.extract_strided_slice %378 {offsets = [0, 26], sizes = [8, 1], strides = [1, 1]} : vector<8x32xf32> to vector<8x1xf32>
    %615 = vector.extract_strided_slice %379 {offsets = [26, 0], sizes = [1, 32], strides = [1, 1]} : vector<32x32xf32> to vector<1x32xf32>
    %616 = vector.broadcast %614 : vector<8x1xf32> to vector<8x32xf32>
    %617 = vector.broadcast %615 : vector<1x32xf32> to vector<8x32xf32>
    %618 = arith.mulf %616, %617 : vector<8x32xf32>
    %619 = vector.extract_strided_slice %380 {offsets = [26, 0], sizes = [1, 32], strides = [1, 1]} : vector<32x32xf32> to vector<1x32xf32>
    %620 = vector.broadcast %619 : vector<1x32xf32> to vector<8x32xf32>
    %621 = arith.addf %618, %620 : vector<8x32xf32>
    %622 = arith.mulf %613, %621 : vector<8x32xf32>
    %623 = vector.extract_strided_slice %378 {offsets = [0, 27], sizes = [8, 1], strides = [1, 1]} : vector<8x32xf32> to vector<8x1xf32>
    %624 = vector.extract_strided_slice %379 {offsets = [27, 0], sizes = [1, 32], strides = [1, 1]} : vector<32x32xf32> to vector<1x32xf32>
    %625 = vector.broadcast %623 : vector<8x1xf32> to vector<8x32xf32>
    %626 = vector.broadcast %624 : vector<1x32xf32> to vector<8x32xf32>
    %627 = arith.mulf %625, %626 : vector<8x32xf32>
    %628 = vector.extract_strided_slice %380 {offsets = [27, 0], sizes = [1, 32], strides = [1, 1]} : vector<32x32xf32> to vector<1x32xf32>
    %629 = vector.broadcast %628 : vector<1x32xf32> to vector<8x32xf32>
    %630 = arith.addf %627, %629 : vector<8x32xf32>
    %631 = arith.mulf %622, %630 : vector<8x32xf32>
    %632 = vector.extract_strided_slice %378 {offsets = [0, 28], sizes = [8, 1], strides = [1, 1]} : vector<8x32xf32> to vector<8x1xf32>
    %633 = vector.extract_strided_slice %379 {offsets = [28, 0], sizes = [1, 32], strides = [1, 1]} : vector<32x32xf32> to vector<1x32xf32>
    %634 = vector.broadcast %632 : vector<8x1xf32> to vector<8x32xf32>
    %635 = vector.broadcast %633 : vector<1x32xf32> to vector<8x32xf32>
    %636 = arith.mulf %634, %635 : vector<8x32xf32>
    %637 = vector.extract_strided_slice %380 {offsets = [28, 0], sizes = [1, 32], strides = [1, 1]} : vector<32x32xf32> to vector<1x32xf32>
    %638 = vector.broadcast %637 : vector<1x32xf32> to vector<8x32xf32>
    %639 = arith.addf %636, %638 : vector<8x32xf32>
    %640 = arith.mulf %631, %639 : vector<8x32xf32>
    %641 = vector.extract_strided_slice %378 {offsets = [0, 29], sizes = [8, 1], strides = [1, 1]} : vector<8x32xf32> to vector<8x1xf32>
    %642 = vector.extract_strided_slice %379 {offsets = [29, 0], sizes = [1, 32], strides = [1, 1]} : vector<32x32xf32> to vector<1x32xf32>
    %643 = vector.broadcast %641 : vector<8x1xf32> to vector<8x32xf32>
    %644 = vector.broadcast %642 : vector<1x32xf32> to vector<8x32xf32>
    %645 = arith.mulf %643, %644 : vector<8x32xf32>
    %646 = vector.extract_strided_slice %380 {offsets = [29, 0], sizes = [1, 32], strides = [1, 1]} : vector<32x32xf32> to vector<1x32xf32>
    %647 = vector.broadcast %646 : vector<1x32xf32> to vector<8x32xf32>
    %648 = arith.addf %645, %647 : vector<8x32xf32>
    %649 = arith.mulf %640, %648 : vector<8x32xf32>
    %650 = vector.extract_strided_slice %378 {offsets = [0, 30], sizes = [8, 1], strides = [1, 1]} : vector<8x32xf32> to vector<8x1xf32>
    %651 = vector.extract_strided_slice %379 {offsets = [30, 0], sizes = [1, 32], strides = [1, 1]} : vector<32x32xf32> to vector<1x32xf32>
    %652 = vector.broadcast %650 : vector<8x1xf32> to vector<8x32xf32>
    %653 = vector.broadcast %651 : vector<1x32xf32> to vector<8x32xf32>
    %654 = arith.mulf %652, %653 : vector<8x32xf32>
    %655 = vector.extract_strided_slice %380 {offsets = [30, 0], sizes = [1, 32], strides = [1, 1]} : vector<32x32xf32> to vector<1x32xf32>
    %656 = vector.broadcast %655 : vector<1x32xf32> to vector<8x32xf32>
    %657 = arith.addf %654, %656 : vector<8x32xf32>
    %658 = arith.mulf %649, %657 : vector<8x32xf32>
    %659 = vector.extract_strided_slice %378 {offsets = [0, 31], sizes = [8, 1], strides = [1, 1]} : vector<8x32xf32> to vector<8x1xf32>
    %660 = vector.extract_strided_slice %379 {offsets = [31, 0], sizes = [1, 32], strides = [1, 1]} : vector<32x32xf32> to vector<1x32xf32>
    %661 = vector.broadcast %659 : vector<8x1xf32> to vector<8x32xf32>
    %662 = vector.broadcast %660 : vector<1x32xf32> to vector<8x32xf32>
    %663 = arith.mulf %661, %662 : vector<8x32xf32>
    %664 = vector.extract_strided_slice %380 {offsets = [31, 0], sizes = [1, 32], strides = [1, 1]} : vector<32x32xf32> to vector<1x32xf32>
    %665 = vector.broadcast %664 : vector<1x32xf32> to vector<8x32xf32>
    %666 = arith.addf %663, %665 : vector<8x32xf32>
    %667 = arith.mulf %658, %666 : vector<8x32xf32>
    %cst_23 = arith.constant 1.000000e-30 : f32
    %668 = vector.broadcast %cst_23 : f32 to vector<8x32xf32>
    %669 = arith.maximumf %667, %668 : vector<8x32xf32>
    %670 = math.log %669 : vector<8x32xf32>
    %cst_24 = arith.constant 1.000000e+00 : f32
    %671 = vector.broadcast %cst_24 : f32 to vector<8x32xf32>
    %672 = arith.subf %671, %670 : vector<8x32xf32>
    %673 = tpu.reciprocal %672 {approx = true} : vector<8x32xf32> -> vector<8x32xf32>
    %674 = tpu.iota {dimensions = array<i32: 1>} : vector<8x32xi32>
    %c16_i32_25 = arith.constant 16 : i32
    %675 = vector.broadcast %c16_i32_25 : i32 to vector<8x32xi32>
    %676 = arith.cmpi slt, %674, %675 : vector<8x32xi32>
    %cst_26 = arith.constant 1.000000e+00 : f32
    %677 = vector.broadcast %cst_26 : f32 to vector<8x32xf32>
    %678 = arith.subf %677, %673 : vector<8x32xf32>
    %679 = arith.select %676, %673, %678 : vector<8x32xi1>, vector<8x32xf32>
    %c0_27 = arith.constant 0 : index
    %c0_28 = arith.constant 0 : index
    %680 = vector.load %arg13[%c0_27, %c0_28] : memref<1x128xf32, #tpu.memory_space<vmem>>, vector<1x128xf32>
    %c0_29 = arith.constant 0 : index
    %c0_30 = arith.constant 0 : index
    %681 = vector.load %arg11[%c0_29, %c0_30] : memref<32x128xf32, #tpu.memory_space<vmem>>, vector<32x128xf32>
    %cst_31 = arith.constant dense<0.000000e+00> : vector<8x128xf32>
    %682 = tpu.matmul %679, %681, %cst_31 {dimension_numbers = #tpu.dot_dimension_numbers<[1], [0], [0], [1], [0, 0, 1, 1], [], []>} : vector<8x32xf32>, vector<32x128xf32>, vector<8x128xf32> -> vector<8x128xf32>
    %683 = vector.broadcast %680 : vector<1x128xf32> to vector<8x128xf32>
    %684 = arith.addf %683, %682 : vector<8x128xf32>
    %c0_32 = arith.constant 0 : index
    %c0_33 = arith.constant 0 : index
    %685 = vector.load %arg12[%c0_32, %c0_33] : memref<32x128xf32, #tpu.memory_space<vmem>>, vector<32x128xf32>
    %cst_34 = arith.constant dense<0.000000e+00> : vector<8x128xf32>
    %686 = tpu.matmul %378, %685, %cst_34 {dimension_numbers = #tpu.dot_dimension_numbers<[1], [0], [0], [1], [0, 0, 1, 1], [], []>} : vector<8x32xf32>, vector<32x128xf32>, vector<8x128xf32> -> vector<8x128xf32>
    %687 = arith.addf %684, %686 : vector<8x128xf32>
    %c0_35 = arith.constant 0 : index
    %c0_36 = arith.constant 0 : index
    %688 = vector.load %arg14[%c0_35, %c0_36] : memref<8x128xf32, #tpu.memory_space<vmem>>, vector<8x128xf32>
    tpu.vector_store %arg14[%c0_35, %c0_36], %687 {strides = array<i32>} : memref<8x128xf32, #tpu.memory_space<vmem>>, vector<8x128xf32>,
    %689 = arith.truncf %38 : vector<8x36xf32> to vector<8x36xbf16>
    %c0_37 = arith.constant 0 : index
    %c0_38 = arith.constant 0 : index
    %690 = vector.load %arg6[%c0_37, %c0_38] : memref<36x32xbf16, #tpu.memory_space<vmem>>, vector<36x32xbf16>
    %cst_39 = arith.constant dense<0.000000e+00> : vector<8x32xf32>
    %691 = tpu.matmul %689, %690, %cst_39 {dimension_numbers = #tpu.dot_dimension_numbers<[1], [0], [0], [1], [0, 0, 1, 1], [], []>} : vector<8x36xbf16>, vector<36x32xbf16>, vector<8x32xf32> -> vector<8x32xf32>
    %c0_40 = arith.constant 0 : index
    %c0_41 = arith.constant 0 : index
    %692 = vector.load %arg3[%c0_40, %c0_41] : memref<1x32xf32, #tpu.memory_space<vmem>>, vector<1x32xf32>
    %693 = vector.broadcast %692 : vector<1x32xf32> to vector<8x32xf32>
    %694 = arith.cmpf ogt, %691, %693 : vector<8x32xf32>
    %cst_42 = arith.constant 1.000000e+00 : f32
    %cst_43 = arith.constant 0.000000e+00 : f32
    %695 = vector.broadcast %cst_42 : f32 to vector<8x32xf32>
    %696 = vector.broadcast %cst_43 : f32 to vector<8x32xf32>
    %697 = arith.select %694, %695, %696 : vector<8x32xi1>, vector<8x32xf32>
    %698 = arith.truncf %697 : vector<8x32xf32> to vector<8x32xbf16>
    %c0_44 = arith.constant 0 : index
    %c0_45 = arith.constant 0 : index
    %699 = vector.load %arg10[%c0_44, %c0_45] : memref<32x32xbf16, #tpu.memory_space<vmem>>, vector<32x32xbf16>
    %cst_46 = arith.constant dense<0.000000e+00> : vector<8x32xf32>
    %700 = tpu.matmul %698, %699, %cst_46 {dimension_numbers = #tpu.dot_dimension_numbers<[1], [0], [0], [1], [0, 0, 1, 1], [], []>} : vector<8x32xbf16>, vector<32x32xbf16>, vector<8x32xf32> -> vector<8x32xf32>
    %c0_47 = arith.constant 0 : index
    %c0_48 = arith.constant 0 : index
    %701 = vector.load %arg7[%c0_47, %c0_48] : memref<1x32xf32, #tpu.memory_space<vmem>>, vector<1x32xf32>
    %702 = vector.broadcast %701 : vector<1x32xf32> to vector<8x32xf32>
    %703 = arith.cmpf ogt, %700, %702 : vector<8x32xf32>
    %cst_49 = arith.constant 1.000000e+00 : f32
    %cst_50 = arith.constant 0.000000e+00 : f32
    %704 = vector.broadcast %cst_49 : f32 to vector<8x32xf32>
    %705 = vector.broadcast %cst_50 : f32 to vector<8x32xf32>
    %706 = arith.select %703, %704, %705 : vector<8x32xi1>, vector<8x32xf32>
    %c0_51 = arith.constant 0 : index
    %c0_52 = arith.constant 0 : index
    %707 = vector.load %arg13[%c0_51, %c0_52] : memref<1x128xf32, #tpu.memory_space<vmem>>, vector<1x128xf32>
    %c0_53 = arith.constant 0 : index
    %c0_54 = arith.constant 0 : index
    %708 = vector.load %arg11[%c0_53, %c0_54] : memref<32x128xf32, #tpu.memory_space<vmem>>, vector<32x128xf32>
    %cst_55 = arith.constant dense<0.000000e+00> : vector<8x128xf32>
    %709 = tpu.matmul %706, %708, %cst_55 {dimension_numbers = #tpu.dot_dimension_numbers<[1], [0], [0], [1], [0, 0, 1, 1], [], []>} : vector<8x32xf32>, vector<32x128xf32>, vector<8x128xf32> -> vector<8x128xf32>
    %710 = vector.broadcast %707 : vector<1x128xf32> to vector<8x128xf32>
    %711 = arith.addf %710, %709 : vector<8x128xf32>
    %c0_56 = arith.constant 0 : index
    %c0_57 = arith.constant 0 : index
    %712 = vector.load %arg12[%c0_56, %c0_57] : memref<32x128xf32, #tpu.memory_space<vmem>>, vector<32x128xf32>
    %cst_58 = arith.constant dense<0.000000e+00> : vector<8x128xf32>
    %713 = tpu.matmul %697, %712, %cst_58 {dimension_numbers = #tpu.dot_dimension_numbers<[1], [0], [0], [1], [0, 0, 1, 1], [], []>} : vector<8x32xf32>, vector<32x128xf32>, vector<8x128xf32> -> vector<8x128xf32>
    %714 = arith.addf %711, %713 : vector<8x128xf32>
    %c0_59 = arith.constant 0 : index
    %c0_60 = arith.constant 0 : index
    %715 = vector.load %arg15[%c0_59, %c0_60] : memref<8x128xf32, #tpu.memory_space<vmem>>, vector<8x128xf32>
    tpu.vector_store %arg15[%c0_59, %c0_60], %714 {strides = array<i32>} : memref<8x128xf32, #tpu.memory_space<vmem>>, vector<8x128xf32>,
    return
  }
  func.func @transform_0(%arg0: i32) -> (i32, i32) {
    %c0_i32 = arith.constant 0 : i32
    %c0_i32_0 = arith.constant 0 : i32
    return %arg0, %c0_i32 : i32, i32
  }
  func.func @transform_1(%arg0: i32) -> (i32, i32) {
    %c0_i32 = arith.constant 0 : i32
    %c0_i32_0 = arith.constant 0 : i32
    %c0_i32_1 = arith.constant 0 : i32
    return %c0_i32, %c0_i32_0 : i32, i32
  }
  func.func @transform_2(%arg0: i32) -> (i32, i32) {
    %c0_i32 = arith.constant 0 : i32
    %c0_i32_0 = arith.constant 0 : i32
    %c0_i32_1 = arith.constant 0 : i32
    return %c0_i32, %c0_i32_0 : i32, i32
  }
  func.func @transform_3(%arg0: i32) -> (i32, i32) {
    %c0_i32 = arith.constant 0 : i32
    %c0_i32_0 = arith.constant 0 : i32
    %c0_i32_1 = arith.constant 0 : i32
    return %c0_i32, %c0_i32_0 : i32, i32
  }
  func.func @transform_4(%arg0: i32) -> (i32, i32) {
    %c0_i32 = arith.constant 0 : i32
    %c0_i32_0 = arith.constant 0 : i32
    %c0_i32_1 = arith.constant 0 : i32
    return %c0_i32, %c0_i32_0 : i32, i32
  }
  func.func @transform_5(%arg0: i32) -> (i32, i32) {
    %c0_i32 = arith.constant 0 : i32
    %c0_i32_0 = arith.constant 0 : i32
    %c0_i32_1 = arith.constant 0 : i32
    return %c0_i32, %c0_i32_0 : i32, i32
  }
  func.func @transform_6(%arg0: i32) -> (i32, i32) {
    %c0_i32 = arith.constant 0 : i32
    %c0_i32_0 = arith.constant 0 : i32
    %c0_i32_1 = arith.constant 0 : i32
    return %c0_i32, %c0_i32_0 : i32, i32
  }
  func.func @transform_7(%arg0: i32) -> (i32, i32) {
    %c0_i32 = arith.constant 0 : i32
    %c0_i32_0 = arith.constant 0 : i32
    %c0_i32_1 = arith.constant 0 : i32
    return %c0_i32, %c0_i32_0 : i32, i32
  }
  func.func @transform_8(%arg0: i32) -> (i32, i32) {
    %c0_i32 = arith.constant 0 : i32
    %c0_i32_0 = arith.constant 0 : i32
    %c0_i32_1 = arith.constant 0 : i32
    return %c0_i32, %c0_i32_0 : i32, i32
  }
  func.func @transform_9(%arg0: i32) -> (i32, i32) {
    %c0_i32 = arith.constant 0 : i32
    %c0_i32_0 = arith.constant 0 : i32
    %c0_i32_1 = arith.constant 0 : i32
    return %c0_i32, %c0_i32_0 : i32, i32
  }
  func.func @transform_10(%arg0: i32) -> (i32, i32) {
    %c0_i32 = arith.constant 0 : i32
    %c0_i32_0 = arith.constant 0 : i32
    %c0_i32_1 = arith.constant 0 : i32
    return %c0_i32, %c0_i32_0 : i32, i32
  }
  func.func @transform_11(%arg0: i32) -> (i32, i32) {
    %c0_i32 = arith.constant 0 : i32
    %c0_i32_0 = arith.constant 0 : i32
    %c0_i32_1 = arith.constant 0 : i32
    return %c0_i32, %c0_i32_0 : i32, i32
  }
  func.func @transform_12(%arg0: i32) -> (i32, i32) {
    %c0_i32 = arith.constant 0 : i32
    %c0_i32_0 = arith.constant 0 : i32
    %c0_i32_1 = arith.constant 0 : i32
    return %c0_i32, %c0_i32_0 : i32, i32
  }
  func.func @transform_13(%arg0: i32) -> (i32, i32) {
    %c0_i32 = arith.constant 0 : i32
    %c0_i32_0 = arith.constant 0 : i32
    return %arg0, %c0_i32 : i32, i32
  }
  func.func @transform_14(%arg0: i32) -> (i32, i32) {
    %c0_i32 = arith.constant 0 : i32
    %c0_i32_0 = arith.constant 0 : i32
    return %arg0, %c0_i32 : i32, i32
  }
}

</mosaic_0001>

<bundles_post_ra>
// kernel: _lambda_.1
= control target key start
LH: loop header
LB: loop body
LE: loop exit
PB: predicated region body
PF: predicated region fallthrough
CT: control target
= control target key end

     0   :  { %v1925_v0 = vmov 5   ;;  %v1926_v2 = vmov 7   ;;  %v2564_v3 = vmov 0.0   ;;  %v1928_v4 = vmov 6   ;;  %s1930_s19 = smov 4   ;;  %s1931_s20 = smov 12   ;;  %s2546_s0 = inlined_call_operand.vmem [shape: f32[8,8], index: 0, kind: input, shape index: {}]   ;;  %s2547_s1 = inlined_call_operand.vmem [shape: f32[4,4], index: 1, kind: input, shape index: {}]   ;;  %s2548_s5 = inlined_call_operand.vmem [shape: bf16[36,32], index: 5, kind: input, shape index: {}]   ;;  %s2549_s9 = inlined_call_operand.vmem [shape: bf16[32,32], index: 9, kind: input, shape index: {}]   ;;  %s2550_s3 = inlined_call_operand.vmem [shape: f32[36,32], index: 3, kind: input, shape index: {}]   ;;  %s2551_s4 = inlined_call_operand.vmem [shape: f32[36,32], index: 4, kind: input, shape index: {}]   ;;  %s2552_s2 = inlined_call_operand.vmem [shape: f32[1,32], index: 2, kind: input, shape index: {}]   ;;  %s2553_s10 = inlined_call_operand.vmem [shape: f32[32,128], index: 10, kind: input, shape index: {}]   ;;  %s2554_s7 = inlined_call_operand.vmem [shape: f32[32,32], index: 7, kind: input, shape index: {}]   ;;  %s2555_s8 = inlined_call_operand.vmem [shape: f32[32,32], index: 8, kind: input, shape index: {}]   ;;  %s2556_s6 = inlined_call_operand.vmem [shape: f32[1,32], index: 6, kind: input, shape index: {}]   ;;  %s2557_s11 = inlined_call_operand.vmem [shape: f32[32,128], index: 11, kind: input, shape index: {}]   ;;  %s2558_s12 = inlined_call_operand.vmem [shape: f32[1,128], index: 12, kind: input, shape index: {}]   ;;  %s2559_s13 = inlined_call_operand.vmem [shape: f32[8,128], index: 13, kind: output, shape index: {0}]   ;;  %s2560_s14 = inlined_call_operand.vmem [shape: f32[8,128], index: 14, kind: output, shape index: {1}]  }
   0x1   :  { %1837 = vset.pattern.permute.xlu0 %v1925_v0  ;;  %v2047_v1 = vld [vmem:[%s2546_s0] sm:$0xff]  ;;  %1839 = vset.pattern.permute.xlu1 %v1926_v2  ;;  %v1929_v5 = vmov 4   ;;  %v54_v6 = vlaneseq  ;;  %v1911_v19 = vld [vmem:[%s2548_s5 + $0x8] sm:$0xff]   ;;  %s1932_s21 = smov 8   ;;  %vm1367_vm3 = vcmask 1041408   ;;  %v1933_v28 = vmov 1  }
   0x2   :  { %61 = vperm.xlu0 %1837, %v2047_v1   ;;  %81 = vperm.xlu1 %1839, %v2047_v1   ;;  %v48_v10 = vld [vmem:[%s2547_s1] sm:$0xf]  ;;  %v1912_v25 = vld [vmem:[%s2548_s5 + $0x10] ss:$0 sps:$4 sm:$0x33]   ;;  %v1934_v29 = vmov 0  }
   0x3   :  { %1725 = vmatprep.subr.bf16.mxu1 %v2564_v3  ;;  %v2058_v7 = vshrl.u32 %v54_v6, 7  ;;  %v1910_v16 = vld [vmem:[%s2548_s5] sm:$0xff]   ;;  %v1369_v27 = vsel %vm1367_vm3, %v1912_v25, 0  ;;  %vm1935_vm5 = vmmov 0   ;;  %vm102_vm6 = vcmask 31744   ;;  %s1936_s5 = smov 20  }
   0x4   :  { %1726 = vmatpush3.bf16.msra.mxu1 %v1910_v16  ;;  %1731 = vmatprep.mubr.msk.bf16.mxu1 %vm1935_vm5, %v2564_v3  ;;  %vm104_vm7 = vcmask 64512   ;;  %vm106_vm8 = vcmask 97280   ;;  %vm118_vm9 = vcmask 162816   ;;  %vm1363_vm10 = vcmask 293888  }
   0x5   :  { %v2061_v8 = vsub.s32 1, %v2058_v7  ;;  %v2064_v9 = vsub.s32 3, %v2058_v7  ;;  %v2072_v13 = vsub.s32 2, %v2058_v7  ;;  %1727 = vmatprep.subr.bf16.mxu1 %v2564_v3  ;;  %v2088_v23 = vsub.s32 0, %v2058_v7  ;;  %1711 = vmatprep.mubr.msk.f32.mxu0 %vm1935_vm5, %v2564_v3 }
   0x6   :  { %1838 = vset.pattern.permute.xlu0 %v1928_v4  ;;  %1840 = vset.pattern.permute.xlu1 %v1929_v5  ;;  %v1937_v43 = vmov 2   ;;  %v1938_v44 = vmov 3   ;;  %v1939_v45 = vmov 9   ;;  %v1940_v46 = vmov 12  }
   0x7   :  { %71 = vperm.xlu0 %1838, %v2047_v1   ;;  %51 = vperm.xlu1 %1840, %v2047_v1   ;;  %v67_v11 = vrot.slane %v48_v10, %v2061_v8  ;;  %v87_v12 = vrot.slane %v48_v10, %v2064_v9  ;;  %v77_v18 = vrot.slane %v48_v10, %v2072_v13  ;;  %v1941_v47 = vmov 8  }
   0x8   :  { %1728 = vmatpush3.bf16.msra.mxu1 %v1911_v19  ;;  %v57_v26 = vrot.slane %v48_v10, %v2088_v23  ;;  %v1942_v48 = vmov 15   ;;  %v1943_v49 = vmov 10   ;;  %v1944_v50 = vmov 18  }
   0x9   :  { %1729 = vmatprep.subr.bf16.mxu1 %v2564_v3  ;;  %v1945_v51 = vmov 11   ;;  %v1946_v52 = vmov 21   ;;  %v1947_v53 = vmov 13   ;;  %v1948_v54 = vmov 24  }
   0xa   :  { %v1949_v55 = vmov 14   ;;  %v1950_v56 = vmov 27   ;;  %v1951_v57 = vmov 16   ;;  %v1952_v58 = vmov 32  }
   0xb   :  { %1842 = vset.pattern.permute.xlu1 %v1933_v28  ;;  %1841 = vset.pattern.permute.xlu0 %v1934_v29  ;;  %v1953_v59 = vmov 17   ;;  %v1954_v60 = vmov 34   ;;  %v1955_v61 = vmov 19   ;;  %v1956_v62 = vmov 20  }
   0xc   :  { %1730 = vmatpush3.bf16.msra.mxu1 %v1369_v27  ;;  %v2568_v63 = vmov 22   ;;  %v2566_v10 = vmov 25   ;;  %v2561_v16 = vmov 29   ;;  %v1965_v19 = vmov 31   ;;  %v125_v27 = vld [vmem:[%s2551_s4] sm:$0xff] }
   0xd   :  { %1735 = vmatprep.subr.bf16.mxu1 %v2564_v3  ;;  %vm1183_vm12 = vcmask 261120  }
  0x81   :  { %v62_v14 = vpop.permute.xlu0 %61  ;;  %v82_v15 = vpop.permute.xlu1 %81 }
  0x82   :  { %vm68_vm0 = vcmp.gt.f32.partialorder %v62_v14, %v67_v11  ;;  %vm88_vm1 = vcmp.gt.f32.partialorder %v82_v15, %v87_v12  ;;  %v1913_v11 = vld [vmem:[%s2549_s9] sm:$0xff]   ;;  %v2563_v12 = vmov 26   ;;  %v1914_v14 = vld [vmem:[%s2549_s9 + $0x8] sm:$0xff]   ;;  %v2562_v15 = vmov 28  }
  0x83   :  { %v69_v17 = vsel %vm68_vm0, 1.0, %v2564_v3  ;;  %v89_v20 = vsel %vm88_vm1, 1.0, %v2564_v3 }
  0x84   :  { %91 = vrot.lane.b32.xlu1 %v69_v17, %s1930_s19  ;;  %v1963_v17 = vmov 33  }
  0x86   :  { %v72_v21 = vpop.permute.xlu0 %71  ;;  %v52_v24 = vpop.permute.xlu1 %51 }
  0x87   :  { %vm78_vm2 = vcmp.gt.f32.partialorder %v72_v21, %v77_v18  ;;  %vm58_vm4 = vcmp.gt.f32.partialorder %v52_v24, %v57_v26  ;;  %v1964_v18 = vmov 30  }
  0x88   :  { %v79_v22 = vsel %vm78_vm2, 1.0, %v2564_v3  ;;  %99 = vrot.lane.b32.xlu1 %v89_v20, %s1931_s20  ;;  %v59_v31 = vsel %vm58_vm4, 1.0, %v2564_v3  ;;  %v1966_v20 = vmov 35  }
  0x89   :  { %95 = vrot.lane.b32.xlu0 %v79_v22, %s1932_s21  ;;  %v120_v22 = vld [vmem:[%s2550_s3] sm:$0xff] }
  0x8a   :  { %v152_v25 = vrot.slane %v120_v22, %v2061_v8  ;;  %v138_v26 = vrot.slane %v120_v22, %v2088_v23 }
  0xf6   :  { %v92_v30 = vpop.permute.xlu1 %91 }
  0xf7   :  { %v103_v33 = vsel %vm102_vm6, %v59_v31, %v92_v30  ;;  %v167_v30 = vrot.slane %v120_v22, %v2072_v13 }
  0xfa   :  { %v100_v32 = vpop.permute.xlu1 %99 }
  0xfb   :  { %v96_v34 = vpop.permute.xlu0 %95 }
  0xfc   :  { %v105_v35 = vsel %vm104_vm7, %v103_v33, %v96_v34  ;;  %v143_v33 = vrot.slane %v125_v27, %v2088_v23 }
  0xfd   :  { %v107_v36 = vsel %vm106_vm8, %v105_v35, %v100_v32  ;;  %v172_v35 = vrot.slane %v125_v27, %v2072_v13 }
  0xfe   :  { %110 = vrot.lane.b32.xlu0 %v107_v36, %s1930_s19  ;;  %v108_v37 = vsub.f32 1.0, %v107_v36 }
 0x100   :  { %114 = vrot.lane.b32.xlu1 %v108_v37, %s1936_s5  ;;  %v2198_v37 = vsub.s32 4, %v2058_v7 }
 0x170   :  { %v111_v38 = vpop.permute.xlu0 %110 }
 0x171   :  { %v117_v39 = vsel %vm102_vm6, %v2047_v1, %v111_v38  ;;  %v2567_v1 = vmov 23  }
 0x172   :  { %v115_v40 = vpop.permute.xlu1 %114 }
 0x173   :  { %v2104_v41 = vsel %vm118_vm9, %v117_v39, %v115_v40  ;;  %v182_v40 = vrot.slane %v120_v22, %v2064_v9 }
 0x174   :  { %146 = vperm.xlu1 %1842, %v2104_v41   ;;  %132 = vperm.xlu0 %1841, %v2104_v41   ;;  %v1342_v42 = vpack.c.bf16 %v2104_v41, %v2104_v41 }
 0x176   :  { %1732 = vmatmul.mubr.msk.bf16.vlgmr.msra.gmra.mrb[0].mxu1 %vm1363_vm10, %v1342_v42 }
 0x177   :  { %1739 = vmatprep.mubr.msk.bf16.mxu1 %vm1935_vm5, %v2564_v3  ;;  %1736 = vmatpush3.bf16.msra.mxu1 %v1913_v11  ;;  %v197_v11 = vrot.slane %v120_v22, %v2198_v37 }
 0x178   :  { %1843 = vset.pattern.permute.xlu1 %v1937_v43  ;;  %1844 = vset.pattern.permute.xlu0 %v1938_v44 }
 0x179   :  { %161 = vperm.xlu1 %1843, %v2104_v41   ;;  %176 = vperm.xlu0 %1844, %v2104_v41  }
 0x17a   :  { %1737 = vmatprep.subr.bf16.mxu1 %v2564_v3 }
 0x17b   :  { %1738 = vmatpush3.bf16.msra.mxu1 %v1914_v14 }
 0x17d   :  { %1845 = vset.pattern.permute.xlu1 %v1929_v5  ;;  %1847 = vset.pattern.permute.xlu0 %v1928_v4 }
 0x17e   :  { %191 = vperm.xlu1 %1845, %v2104_v41   ;;  %221 = vperm.xlu0 %1847, %v2104_v41  }
 0x182   :  { %1846 = vset.pattern.permute.xlu1 %v1925_v0  ;;  %1850 = vset.pattern.permute.xlu0 %v1939_v45 }
 0x183   :  { %206 = vperm.xlu1 %1846, %v2104_v41   ;;  %266 = vperm.xlu0 %1850, %v2104_v41  }
 0x187   :  { %1848 = vset.pattern.permute.xlu1 %v1926_v2  ;;  %1853 = vset.pattern.permute.xlu0 %v1940_v46 }
 0x188   :  { %236 = vperm.xlu1 %1848, %v2104_v41   ;;  %311 = vperm.xlu0 %1853, %v2104_v41  }
 0x18c   :  { %1849 = vset.pattern.permute.xlu1 %v1941_v47  ;;  %1856 = vset.pattern.permute.xlu0 %v1942_v48 }
 0x18d   :  { %251 = vperm.xlu1 %1849, %v2104_v41   ;;  %356 = vperm.xlu0 %1856, %v2104_v41  }
 0x191   :  { %1851 = vset.pattern.permute.xlu1 %v1943_v49  ;;  %1859 = vset.pattern.permute.xlu0 %v1944_v50 }
 0x192   :  { %281 = vperm.xlu1 %1851, %v2104_v41   ;;  %401 = vperm.xlu0 %1859, %v2104_v41  }
 0x196   :  { %1852 = vset.pattern.permute.xlu1 %v1945_v51  ;;  %1862 = vset.pattern.permute.xlu0 %v1946_v52 }
 0x197   :  { %296 = vperm.xlu1 %1852, %v2104_v41   ;;  %446 = vperm.xlu0 %1862, %v2104_v41  }
 0x19b   :  { %1854 = vset.pattern.permute.xlu1 %v1947_v53  ;;  %1865 = vset.pattern.permute.xlu0 %v1948_v54 }
 0x19c   :  { %326 = vperm.xlu1 %1854, %v2104_v41   ;;  %491 = vperm.xlu0 %1865, %v2104_v41  }
 0x1a0   :  { %1855 = vset.pattern.permute.xlu1 %v1949_v55  ;;  %1868 = vset.pattern.permute.xlu0 %v1950_v56 }
 0x1a1   :  { %341 = vperm.xlu1 %1855, %v2104_v41   ;;  %536 = vperm.xlu0 %1868, %v2104_v41  }
 0x1a5   :  { %1857 = vset.pattern.permute.xlu1 %v1951_v57  ;;  %1871 = vset.pattern.permute.xlu0 %v1952_v58 }
 0x1a6   :  { %371 = vperm.xlu1 %1857, %v2104_v41   ;;  %614 = vperm.xlu0 %1871, %v2104_v41  }
 0x1aa   :  { %1858 = vset.pattern.permute.xlu1 %v1953_v59  ;;  %1874 = vset.pattern.permute.xlu0 %v1954_v60 }
 0x1ab   :  { %386 = vperm.xlu1 %1858, %v2104_v41   ;;  %643 = vperm.xlu0 %1874, %v2104_v41  }
 0x1af   :  { %1860 = vset.pattern.permute.xlu1 %v1955_v61  ;;  %1877 = vset.pattern.permute.xlu0 %v1934_v29 }
 0x1b0   :  { %416 = vperm.xlu1 %1860, %v2104_v41  }
 0x1b4   :  { %1861 = vset.pattern.permute.xlu1 %v1956_v62 }
 0x1b5   :  { %431 = vperm.xlu1 %1861, %v2104_v41  }
 0x1b9   :  { %1863 = vset.pattern.permute.xlu1 %v2568_v63 }
 0x1ba   :  { %461 = vperm.xlu1 %1863, %v2104_v41  }
 0x1be   :  { %1864 = vset.pattern.permute.xlu1 %v2567_v1 }
 0x1bf   :  { %476 = vperm.xlu1 %1864, %v2104_v41  }
 0x1c3   :  { %1866 = vset.pattern.permute.xlu1 %v2566_v10 }
 0x1c4   :  { %506 = vperm.xlu1 %1866, %v2104_v41  }
 0x1c8   :  { %1867 = vset.pattern.permute.xlu1 %v2563_v12 }
 0x1c9   :  { %521 = vperm.xlu1 %1867, %v2104_v41  }
 0x1cd   :  { %1869 = vset.pattern.permute.xlu1 %v2562_v15 }
 0x1ce   :  { %551 = vperm.xlu1 %1869, %v2104_v41  }
 0x1d2   :  { %1870 = vset.pattern.permute.xlu1 %v2561_v16 }
 0x1d3   :  { %566 = vperm.xlu1 %1870, %v2104_v41  }
 0x1d7   :  { %1872 = vset.pattern.permute.xlu1 %v1963_v17  ;;  %v187_v17 = vrot.slane %v125_v27, %v2064_v9 }
 0x1d8   :  { %628 = vperm.xlu1 %1872, %v2104_v41  }
 0x1dc   :  { %1873 = vset.pattern.permute.xlu1 %v1964_v18 }
 0x1dd   :  { %581 = vperm.xlu1 %1873, %v2104_v41  }
 0x1e1   :  { %1875 = vset.pattern.permute.xlu1 %v1965_v19 }
 0x1e2   :  { %596 = vperm.xlu1 %1875, %v2104_v41  }
 0x1e6   :  { %1876 = vset.pattern.permute.xlu1 %v1966_v20 }
 0x1e7   :  { %658 = vperm.xlu1 %1876, %v2104_v41   ;;  %v2202_v41 = vsub.s32 5, %v2058_v7 }
 0x1eb   :  { %1878 = vset.pattern.permute.xlu1 %v1933_v28  ;;  %v157_v28 = vrot.slane %v125_v27, %v2061_v8 }
 0x1f3   :  { %v147_v21 = vpop.permute.xlu1 %146  ;;  %v133_v29 = vpop.permute.xlu0 %132 }
 0x1f4   :  { %v153_v32 = vmul.f32 %v152_v25, %v147_v21  ;;  %v139_v34 = vmul.f32 %v138_v26, %v133_v29  ;;  %v212_v21 = vrot.slane %v120_v22, %v2202_v41  ;;  %v202_v26 = vrot.slane %v125_v27, %v2198_v37 }
 0x1f6   :  { %v158_v38 = vadd.f32 %v157_v28, %v153_v32  ;;  %v144_v39 = vadd.f32 %v143_v33, %v139_v34  ;;  %v217_v32 = vrot.slane %v125_v27, %v2202_v41  ;;  %v2213_v34 = vsub.s32 7, %v2058_v7 }
 0x1f8   :  { %v162_v24 = vpop.permute.xlu1 %161  ;;  %v177_v58 = vpop.permute.xlu0 %176  ;;  %v159_v14 = vmul.f32 %v158_v38, %v144_v39 }
 0x1f9   :  { %v168_v36 = vmul.f32 %v167_v30, %v162_v24  ;;  %v183_v20 = vmul.f32 %v182_v40, %v177_v58  ;;  %v2209_v30 = vsub.s32 6, %v2058_v7 }
 0x1fb   :  { %v173_v60 = vadd.f32 %v172_v35, %v168_v36  ;;  %v188_v28 = vadd.f32 %v187_v17, %v183_v20  ;;  %v227_v38 = vrot.slane %v120_v22, %v2209_v30 }
 0x1fd   :  { %v192_v31 = vpop.permute.xlu1 %191  ;;  %v174_v25 = vmul.f32 %v173_v60, %v159_v14  ;;  %v222_v40 = vpop.permute.xlu0 %221  ;;  %v242_v60 = vrot.slane %v120_v22, %v2213_v34  ;;  %v232_v14 = vrot.slane %v125_v27, %v2209_v30 }
 0x1fe   :  { %v198_v29 = vmul.f32 %v197_v11, %v192_v31  ;;  %v121_v31 = vld [vmem:[%s2550_s3 + $0x8] sm:$0xff] }
 0x1ff   :  { %v189_v35 = vmul.f32 %v188_v28, %v174_v25  ;;  %v257_v7 = vrot.slane %v121_v31, %v2088_v23 }
 0x200   :  { %v203_v36 = vadd.f32 %v202_v26, %v198_v29  ;;  %v126_v26 = vld [vmem:[%s2551_s4 + $0x8] sm:$0xff] }
 0x201   :  { %v262_v29 = vrot.slane %v126_v26, %v2088_v23 }
 0x202   :  { %v207_v42 = vpop.permute.xlu1 %206  ;;  %v204_v11 = vmul.f32 %v203_v36, %v189_v35 }
 0x203   :  { %v213_v33 = vmul.f32 %v212_v21, %v207_v42  ;;  %v228_v42 = vmul.f32 %v227_v38, %v222_v40  ;;  %v247_v21 = vrot.slane %v125_v27, %v2213_v34  ;;  %v267_v38 = vpop.permute.xlu0 %266  ;;  %v277_v27 = vrot.slane %v126_v26, %v2061_v8 }
 0x205   :  { %v218_v58 = vadd.f32 %v217_v32, %v213_v33  ;;  %v233_v22 = vadd.f32 %v232_v14, %v228_v42  ;;  %v272_v32 = vrot.slane %v121_v31, %v2061_v8  ;;  %v292_v42 = vrot.slane %v126_v26, %v2072_v13 }
 0x207   :  { %v237_v24 = vpop.permute.xlu1 %236  ;;  %v219_v20 = vmul.f32 %v218_v58, %v204_v11  ;;  %v287_v58 = vrot.slane %v121_v31, %v2072_v13  ;;  %v302_v11 = vrot.slane %v121_v31, %v2064_v9  ;;  %v312_v15 = vpop.permute.xlu0 %311 }
 0x208   :  { %v243_v25 = vmul.f32 %v242_v60, %v237_v24  ;;  %v273_v24 = vmul.f32 %v272_v32, %v267_v38  ;;  %v332_v32 = vrot.slane %v121_v31, %v2202_v41 }
 0x209   :  { %v234_v33 = vmul.f32 %v233_v22, %v219_v20  ;;  %v307_v20 = vrot.slane %v126_v26, %v2064_v9 }
 0x20a   :  { %v248_v35 = vadd.f32 %v247_v21, %v243_v25  ;;  %v317_v25 = vrot.slane %v121_v31, %v2198_v37 }
 0x20c   :  { %v252_v39 = vpop.permute.xlu1 %251  ;;  %v249_v60 = vmul.f32 %v248_v35, %v234_v33  ;;  %v322_v33 = vrot.slane %v126_v26, %v2198_v37  ;;  %v318_v35 = vmul.f32 %v317_v25, %v312_v15  ;;  %v122_v15 = vld [vmem:[%s2550_s3 + $0x10] sm:$0xff]  ;;  %v367_v25 = vrot.slane %v126_v26, %v2213_v34 }
 0x20d   :  { %v258_v28 = vmul.f32 %v257_v7, %v252_v39  ;;  %v278_v7 = vadd.f32 %v277_v27, %v273_v24  ;;  %v337_v27 = vrot.slane %v126_v26, %v2202_v41 }
 0x20e   :  { %v323_v24 = vadd.f32 %v322_v33, %v318_v35 }
 0x20f   :  { %v263_v40 = vadd.f32 %v262_v29, %v258_v28 }
 0x211   :  { %v282_v17 = vpop.permute.xlu1 %281  ;;  %v264_v14 = vmul.f32 %v263_v40, %v249_v60  ;;  %v347_v40 = vrot.slane %v121_v31, %v2209_v30  ;;  %v352_v60 = vrot.slane %v126_v26, %v2209_v30 }
 0x212   :  { %v288_v39 = vmul.f32 %v287_v58, %v282_v17 }
 0x213   :  { %v279_v22 = vmul.f32 %v278_v7, %v264_v14  ;;  %v362_v14 = vrot.slane %v121_v31, %v2213_v34  ;;  %v127_v31 = vld [vmem:[%s2551_s4 + $0x10] sm:$0xff] }
 0x214   :  { %v293_v29 = vadd.f32 %v292_v42, %v288_v39  ;;  %v382_v33 = vrot.slane %v127_v31, %v2088_v23 }
 0x216   :  { %v297_v36 = vpop.permute.xlu1 %296  ;;  %v294_v38 = vmul.f32 %v293_v29, %v279_v22  ;;  %v392_v29 = vrot.slane %v122_v15, %v2061_v8 }
 0x217   :  { %v303_v21 = vmul.f32 %v302_v11, %v297_v36 }
 0x219   :  { %v308_v12 = vadd.f32 %v307_v20, %v303_v21  ;;  %v357_v20 = vpop.permute.xlu0 %356 }
 0x21b   :  { %v327_v16 = vpop.permute.xlu1 %326  ;;  %v309_v58 = vmul.f32 %v308_v12, %v294_v38  ;;  %v377_v12 = vrot.slane %v122_v15, %v2088_v23 }
 0x21c   :  { %v333_v36 = vmul.f32 %v332_v32, %v327_v16  ;;  %v363_v16 = vmul.f32 %v362_v14, %v357_v20  ;;  %v422_v14 = vrot.slane %v122_v15, %v2064_v9 }
 0x21d   :  { %v324_v42 = vmul.f32 %v323_v24, %v309_v58 }
 0x21e   :  { %v338_v39 = vadd.f32 %v337_v27, %v333_v36  ;;  %v368_v38 = vadd.f32 %v367_v25, %v363_v16  ;;  %v407_v27 = vrot.slane %v122_v15, %v2072_v13  ;;  %v427_v25 = vrot.slane %v127_v31, %v2064_v9 }
 0x220   :  { %v342_v28 = vpop.permute.xlu1 %341  ;;  %v339_v22 = vmul.f32 %v338_v39, %v324_v42  ;;  %v412_v42 = vrot.slane %v127_v31, %v2072_v13 }
 0x221   :  { %v348_v11 = vmul.f32 %v347_v40, %v342_v28  ;;  %v397_v40 = vrot.slane %v127_v31, %v2061_v8 }
 0x223   :  { %v353_v21 = vadd.f32 %v352_v60, %v348_v11  ;;  %v402_v60 = vpop.permute.xlu0 %401 }
 0x224   :  { %v408_v39 = vmul.f32 %v407_v27, %v402_v60  ;;  %v467_v27 = vrot.slane %v122_v15, %v2209_v30 }
 0x225   :  { %v372_v17 = vpop.permute.xlu1 %371  ;;  %v354_v32 = vmul.f32 %v353_v21, %v339_v22  ;;  %v437_v21 = vrot.slane %v122_v15, %v2198_v37  ;;  %v442_v22 = vrot.slane %v127_v31, %v2198_v37 }
 0x226   :  { %v378_v35 = vmul.f32 %v377_v12, %v372_v17  ;;  %v413_v16 = vadd.f32 %v412_v42, %v408_v39  ;;  %v472_v42 = vrot.slane %v127_v31, %v2209_v30  ;;  %v2265_v39 = vld [vmem:[%s2550_s3 + $0x18] sm:$0xff] }
 0x227   :  { %v369_v26 = vmul.f32 %v368_v38, %v354_v32  ;;  %v452_v32 = vrot.slane %v122_v15, %v2202_v41 }
 0x228   :  { %v383_v36 = vadd.f32 %v382_v33, %v378_v35 }
 0x22a   :  { %v387_v7 = vpop.permute.xlu1 %386  ;;  %v384_v20 = vmul.f32 %v383_v36, %v369_v26  ;;  %v457_v26 = vrot.slane %v127_v31, %v2202_v41 }
 0x22b   :  { %v393_v58 = vmul.f32 %v392_v29, %v387_v7 }
 0x22d   :  { %v398_v11 = vadd.f32 %v397_v40, %v393_v58  ;;  %v447_v40 = vpop.permute.xlu0 %446 }
 0x22e   :  { %v453_v36 = vmul.f32 %v452_v32, %v447_v40 }
 0x22f   :  { %v417_v28 = vpop.permute.xlu1 %416  ;;  %v399_v12 = vmul.f32 %v398_v11, %v384_v20  ;;  %v482_v11 = vrot.slane %v122_v15, %v2213_v34  ;;  %v2274_v15 = vld [vmem:[%s2551_s4 + $0x18] sm:$0xff] }
 0x230   :  { %v423_v7 = vmul.f32 %v422_v14, %v417_v28  ;;  %v458_v20 = vadd.f32 %v457_v26, %v453_v36  ;;  %v527_v36 = vrot.slane %v2265_v39, %v2072_v13 }
 0x231   :  { %v414_v33 = vmul.f32 %v413_v16, %v399_v12 }
 0x232   :  { %v428_v35 = vadd.f32 %v427_v25, %v423_v7  ;;  %v1668_v25 = vld [vmem:[%s2552_s2] ss:$0 sm:$0xff] }
 0x234   :  { %v432_v24 = vpop.permute.xlu1 %431  ;;  %v429_v60 = vmul.f32 %v428_v35, %v414_v33 }
 0x235   :  { %v438_v29 = vmul.f32 %v437_v21, %v432_v24  ;;  %v487_v21 = vrot.slane %v127_v31, %v2213_v34  ;;  %v512_v31 = vrot.slane %v2265_v39, %v2061_v8 }
 0x237   :  { %v443_v58 = vadd.f32 %v442_v22, %v438_v29  ;;  %v492_v29 = vpop.permute.xlu0 %491 }
 0x239   :  { %v462_v17 = vpop.permute.xlu1 %461  ;;  %v444_v14 = vmul.f32 %v443_v58, %v429_v60 }
 0x23a   :  { %v468_v24 = vmul.f32 %v467_v27, %v462_v17  ;;  %v497_v17 = vrot.slane %v2265_v39, %v2088_v23 }
 0x23b   :  { %v459_v7 = vmul.f32 %v458_v20, %v444_v14 }
 0x23c   :  { %v473_v16 = vadd.f32 %v472_v42, %v468_v24  ;;  %v498_v27 = vmul.f32 %v497_v17, %v492_v29  ;;  %v517_v24 = vrot.slane %v2274_v15, %v2061_v8  ;;  %v542_v17 = vrot.slane %v2265_v39, %v2064_v9 }
 0x23e   :  { %v477_v38 = vpop.permute.xlu1 %476  ;;  %v474_v26 = vmul.f32 %v473_v16, %v459_v7 }
 0x23f   :  { %v483_v12 = vmul.f32 %v482_v11, %v477_v38  ;;  %v502_v38 = vrot.slane %v2274_v15, %v2088_v23 }
 0x241   :  { %v488_v33 = vadd.f32 %v487_v21, %v483_v12  ;;  %v503_v21 = vadd.f32 %v502_v38, %v498_v27  ;;  %v532_v12 = vrot.slane %v2274_v15, %v2072_v13  ;;  %v124_v27 = vld [vmem:[%s2550_s3 + $0x20] sm:$0xf] }
 0x243   :  { %v507_v28 = vpop.permute.xlu1 %506  ;;  %v489_v42 = vmul.f32 %v488_v33, %v474_v26 }
 0x244   :  { %v513_v20 = vmul.f32 %v512_v31, %v507_v28  ;;  %v557_v28 = vrot.slane %v2265_v39, %v2198_v37  ;;  %v547_v31 = vrot.slane %v2274_v15, %v2064_v9 }
 0x245   :  { %v504_v7 = vmul.f32 %v503_v21, %v489_v42  ;;  %v587_v42 = vrot.slane %v2265_v39, %v2209_v30  ;;  %v577_v21 = vrot.slane %v2274_v15, %v2202_v41 }
 0x246   :  { %v518_v16 = vadd.f32 %v517_v24, %v513_v20 }
 0x248   :  { %v522_v22 = vpop.permute.xlu1 %521  ;;  %v519_v38 = vmul.f32 %v518_v16, %v504_v7 }
 0x249   :  { %v1405_v32 = vpop.f32.mrb[0].mxu1 }
 0x24a   :  { %vm1418_vm11 = vcmp.gt.f32.partialorder %v1405_v32, %v1668_v25  ;;  %v1733_v35 = vpop.f32.mrb[1].mxu1  ;;  %v528_v25 = vmul.f32 %v527_v36, %v522_v22  ;;  %v537_v32 = vpop.permute.xlu0 %536  ;;  %v562_v36 = vrot.slane %v2274_v15, %v2198_v37 }
 0x24b   :  { %v2283_v40 = vsel %vm1418_vm11, 1.0, %v2564_v3  ;;  %v1408_v58 = vpop.f32.mrb[2].mxu1  ;;  %v543_v35 = vmul.f32 %v542_v17, %v537_v32  ;;  %v129_v17 = vld [vmem:[%s2551_s4 + $0x20] sm:$0xf] }
 0x24c   :  { %v1420_v60 = vpack.c.bf16 %v2283_v40, %v2283_v40  ;;  %v1734_v11 = vpop.f32.mrb[3].mxu1  ;;  %v533_v33 = vadd.f32 %v532_v12, %v528_v25  ;;  %v572_v58 = vrot.slane %v2265_v39, %v2202_v41  ;;  %v620_v25 = vrot.slane %v124_v27, %v2088_v23 }
 0x24d   :  { %v552_v14 = vpop.permute.xlu1 %551  ;;  %v634_v11 = vrot.slane %v124_v27, %v2061_v8  ;;  %v548_v24 = vadd.f32 %v547_v31, %v543_v35 }
 0x24e   :  { %1740 = vmatmul.mubr.msk.bf16.vlgmr.msra.gmra.mrb[4].mxu1 %vm1183_vm12, %v1420_v60  ;;  %v534_v26 = vmul.f32 %v533_v33, %v519_v38  ;;  %v558_v60 = vmul.f32 %v557_v28, %v552_v14  ;;  %v615_v20 = vpop.permute.xlu0 %614  ;;  %v592_v14 = vrot.slane %v2274_v15, %v2209_v30  ;;  %v639_v33 = vrot.slane %v129_v17, %v2061_v8 }
 0x24f   :  { %1751 = vmatprep.mubr.msk.f32.mxu1 %vm1935_vm5, %v2564_v3  ;;  %v625_v38 = vrot.slane %v129_v17, %v2088_v23  ;;  %v649_v3 = vrot.slane %v124_v27, %v2072_v13 }
 0x250   :  { %v549_v7 = vmul.f32 %v548_v24, %v534_v26  ;;  %v563_v16 = vadd.f32 %v562_v36, %v558_v60  ;;  %v607_v60 = vrot.slane %v2274_v15, %v2213_v34 }
 0x252   :  { %v567_v29 = vpop.permute.xlu1 %566  ;;  %v644_v10 = vpop.permute.xlu0 %643  ;;  %v564_v26 = vmul.f32 %v563_v16, %v549_v7 }
 0x253   :  { %v573_v12 = vmul.f32 %v572_v58, %v567_v29  ;;  %v602_v29 = vrot.slane %v2265_v39, %v2213_v34  ;;  %v621_v58 = vmul.f32 %v620_v25, %v615_v20  ;;  %v664_v39 = vrot.slane %v124_v27, %v2064_v9 }
 0x255   :  { %v578_v35 = vadd.f32 %v577_v21, %v573_v12  ;;  %v650_v21 = vmul.f32 %v649_v3, %v644_v10 }
 0x257   :  { %v629_v22 = vpop.permute.xlu1 %628  ;;  %v579_v63 = vmul.f32 %v578_v35, %v564_v26 }
 0x258   :  { %v635_v28 = vmul.f32 %v634_v11, %v629_v22  ;;  %v626_v11 = vadd.f32 %v625_v38, %v621_v58 }
 0x25a   :  { %v640_v24 = vadd.f32 %v639_v33, %v635_v28 }
 0x25c   :  { %v582_v32 = vpop.permute.xlu1 %581  ;;  %v641_v25 = vmul.f32 %v640_v24, %v626_v11 }
 0x25d   :  { %v588_v31 = vmul.f32 %v587_v42, %v582_v32  ;;  %v654_v42 = vrot.slane %v129_v17, %v2072_v13  ;;  %v669_v32 = vrot.slane %v129_v17, %v2064_v9  ;;  %v2331_v17 = vand.u32 127, %v54_v6  ;;  %v1490_v6 = vld [vmem:[%s2553_s10] sm:$0xff] }
 0x25f   :  { %v593_v36 = vadd.f32 %v592_v14, %v588_v31  ;;  %v655_v14 = vadd.f32 %v654_v42, %v650_v21  ;;  %vm680_vm13 = vcmp.lt.s32.totalorder %v2331_v17, 16 }
 0x261   :  { %v597_v1 = vpop.permute.xlu1 %596  ;;  %v594_v12 = vmul.f32 %v593_v36, %v579_v63  ;;  %v656_v33 = vmul.f32 %v655_v14, %v641_v25 }
 0x262   :  { %v603_v22 = vmul.f32 %v602_v29, %v597_v1 }
 0x264   :  { %v608_v20 = vadd.f32 %v607_v60, %v603_v22 }
 0x266   :  { %v609_v7 = vmul.f32 %v608_v20, %v594_v12  ;;  %v659_v16 = vpop.permute.xlu1 %658 }
 0x267   :  { %v665_v31 = vmul.f32 %v664_v39, %v659_v16 }
 0x268   :  { %v610_v15 = vmax.f32 %v609_v7, 1e-30 }
 0x269   :  { %v670_v28 = vadd.f32 %v669_v32, %v665_v31 }
 0x26a   :  { %1915 = vlog2.f32 %v610_v15 }
 0x26b   :  { %v671_v35 = vmul.f32 %v670_v28, %v656_v33 }
 0x26d   :  { %v672_v1 = vmax.f32 %v671_v35, 1e-30 }
 0x26f   :  { %1917 = vlog2.f32 %v672_v1 }
 0x274   :  { %v1916_v29 = vpop.eup %1915 }
 0x275   :  { %v612_v10 = vmul.f32 0.6931472, %v1916_v29 }
 0x279   :  { %v1918_v3 = vpop.eup %1917 }
 0x27a   :  { %v674_v27 = vmul.f32 0.6931472, %v1918_v3 }
 0x27c   :  { %v675_v63 = vadd.f32 %v674_v27, %v612_v10 }
 0x27e   :  { %v676_v38 = vsub.f32 1.0, %v675_v63 }
 0x280   :  { %1919 = vrcp.f32 %v676_v38 }
 0x28a   :  { %v1920_v58 = vpop.eup %1919 }
 0x28b   :  { %v681_v26 = vsub.f32 1.0, %v1920_v58 }
 0x28d   :  { %v2336_v36 = vsel %vm680_vm13, %v1920_v58, %v681_v26 }
 0x28e   :  { %707 = vperm.xlu1 %1878, %v2336_v36   ;;  %693 = vperm.xlu0 %1877, %v2336_v36  }
 0x292   :  { %1879 = vset.pattern.permute.xlu1 %v1937_v43  ;;  %1880 = vset.pattern.permute.xlu0 %v1938_v44  ;;  %v1491_v43 = vld [vmem:[%s2553_s10 + $0x8] sm:$0xff] }
 0x293   :  { %722 = vperm.xlu1 %1879, %v2336_v36   ;;  %737 = vperm.xlu0 %1880, %v2336_v36   ;;  %v1778_v44 = vpack.c.bf16 %v1491_v43, %v1490_v6  ;;  %v1672_v43 = vld [vmem:[%s2556_s6] ss:$0 sm:$0xff] }
 0x297   :  { %1881 = vset.pattern.permute.xlu1 %v1929_v5  ;;  %1883 = vset.pattern.permute.xlu0 %v1928_v4  ;;  %v1967_v4 = vmov 0.0|0.0   ;;  %v1492_v5 = vld [vmem:[%s2553_s10 + $0x10] sm:$0xff] }
 0x298   :  { %752 = vperm.xlu1 %1881, %v2336_v36   ;;  %782 = vperm.xlu0 %1883, %v2336_v36  }
 0x299   :  { %1777 = vmatprep.subr.bf16.mxu1 %v1967_v4  ;;  %1765 = vmatprep.subr.bf16.mxu0 %v1967_v4 }
 0x29a   :  { %1779 = vmatpush3.bf16.msra.mxu1 %v1778_v44  ;;  %1767 = vmatpush3.bf16.msra.mxu0 %v1778_v44 }
 0x29b   :  { %1780 = vmatprep.subr.bf16.mxu1 %v1967_v4  ;;  %1768 = vmatprep.subr.bf16.mxu0 %v1967_v4 }
 0x29c   :  { %1882 = vset.pattern.permute.xlu1 %v1925_v0  ;;  %1886 = vset.pattern.permute.xlu0 %v1939_v45  ;;  %v1493_v0 = vld [vmem:[%s2553_s10 + $0x18] sm:$0xff] }
 0x29d   :  { %767 = vperm.xlu1 %1882, %v2336_v36   ;;  %827 = vperm.xlu0 %1886, %v2336_v36   ;;  %v1781_v45 = vpack.c.bf16 %v1493_v0, %v1492_v5 }
 0x29f   :  { %1782 = vmatpush3.bf16.msra.mxu1 %v1781_v45  ;;  %1770 = vmatpush3.bf16.msra.mxu0 %v1781_v45  ;;  %v684_v45 = vld [vmem:[%s2554_s7 + $0x8] sm:$0xff] }
 0x2a0   :  { %1771 = vmatprep.subr.bf16.mxu0 %v1967_v4 }
 0x2a1   :  { %1884 = vset.pattern.permute.xlu1 %v1926_v2  ;;  %1889 = vset.pattern.permute.xlu0 %v1940_v46  ;;  %v2569_v2 = vmov 22   ;;  %v2570_v46 = vmov 23  }
 0x2a2   :  { %797 = vperm.xlu1 %1884, %v2336_v36   ;;  %872 = vperm.xlu0 %1889, %v2336_v36  }
 0x2a6   :  { %1885 = vset.pattern.permute.xlu1 %v1941_v47  ;;  %1892 = vset.pattern.permute.xlu0 %v1942_v48  ;;  %v2571_v47 = vmov 25   ;;  %v2572_v48 = vmov 26  }
 0x2a7   :  { %812 = vperm.xlu1 %1885, %v2336_v36   ;;  %917 = vperm.xlu0 %1892, %v2336_v36  }
 0x2ab   :  { %1887 = vset.pattern.permute.xlu1 %v1943_v49  ;;  %1895 = vset.pattern.permute.xlu0 %v1944_v50  ;;  %v2573_v49 = vmov 28   ;;  %v2574_v50 = vmov 29  }
 0x2ac   :  { %842 = vperm.xlu1 %1887, %v2336_v36   ;;  %962 = vperm.xlu0 %1895, %v2336_v36  }
 0x2b0   :  { %1888 = vset.pattern.permute.xlu1 %v1945_v51  ;;  %1898 = vset.pattern.permute.xlu0 %v1946_v52  ;;  %v683_v51 = vld [vmem:[%s2554_s7] sm:$0xff] }
 0x2b1   :  { %857 = vperm.xlu1 %1888, %v2336_v36   ;;  %1007 = vperm.xlu0 %1898, %v2336_v36   ;;  %v687_v52 = vld [vmem:[%s2555_s8] sm:$0xff]  ;;  %v743_v22 = vrot.slane %v683_v51, %v2064_v9  ;;  %v758_v39 = vrot.slane %v683_v51, %v2198_v37  ;;  %v773_v33 = vrot.slane %v683_v51, %v2202_v41 }
 0x2b2   :  { %v733_v24 = vrot.slane %v687_v52, %v2072_v13  ;;  %v748_v25 = vrot.slane %v687_v52, %v2064_v9  ;;  %v763_v16 = vrot.slane %v687_v52, %v2198_v37  ;;  %v788_v1 = vrot.slane %v683_v51, %v2209_v30 }
 0x2b3   :  { %v778_v29 = vrot.slane %v687_v52, %v2202_v41  ;;  %v803_v63 = vrot.slane %v683_v51, %v2213_v34  ;;  %v793_v58 = vrot.slane %v687_v52, %v2209_v30  ;;  %v808_v5 = vrot.slane %v687_v52, %v2213_v34 }
 0x2b5   :  { %1890 = vset.pattern.permute.xlu1 %v1947_v53  ;;  %1901 = vset.pattern.permute.xlu0 %v1948_v54  ;;  %v713_v53 = vrot.slane %v683_v51, %v2061_v8  ;;  %v699_v54 = vrot.slane %v683_v51, %v2088_v23 }
 0x2b6   :  { %887 = vperm.xlu1 %1890, %v2336_v36   ;;  %1052 = vperm.xlu0 %1901, %v2336_v36  }
 0x2ba   :  { %1891 = vset.pattern.permute.xlu1 %v1949_v55  ;;  %1904 = vset.pattern.permute.xlu0 %v1950_v56  ;;  %v718_v55 = vrot.slane %v687_v52, %v2061_v8 }
 0x2bb   :  { %902 = vperm.xlu1 %1891, %v2336_v36   ;;  %1097 = vperm.xlu0 %1904, %v2336_v36  }
 0x2bf   :  { %1893 = vset.pattern.permute.xlu1 %v1951_v57  ;;  %1907 = vset.pattern.permute.xlu0 %v1964_v18  ;;  %v704_v57 = vrot.slane %v687_v52, %v2088_v23  ;;  %v728_v18 = vrot.slane %v683_v51, %v2072_v13  ;;  %v2575_v51 = vmov 0.0   ;;  %v833_v52 = vrot.slane %v684_v45, %v2061_v8 }
 0x2c0   :  { %932 = vperm.xlu1 %1893, %v2336_v36   ;;  %1142 = vperm.xlu0 %1907, %v2336_v36  }
 0x2c4   :  { %1894 = vset.pattern.permute.xlu1 %v1953_v59  ;;  %1909 = vset.pattern.permute.xlu0 %v1965_v19 }
 0x2c5   :  { %947 = vperm.xlu1 %1894, %v2336_v36  }
 0x2c9   :  { %1896 = vset.pattern.permute.xlu1 %v1955_v61 }
 0x2ca   :  { %977 = vperm.xlu1 %1896, %v2336_v36  }
 0x2ce   :  { %1897 = vset.pattern.permute.xlu1 %v1956_v62 }
 0x2cf   :  { %992 = vperm.xlu1 %1897, %v2336_v36  }
 0x2d3   :  { %1899 = vset.pattern.permute.xlu1 %v2569_v2 }
 0x2d4   :  { %1022 = vperm.xlu1 %1899, %v2336_v36  }
 0x2d8   :  { %1900 = vset.pattern.permute.xlu1 %v2570_v46 }
 0x2d9   :  { %1037 = vperm.xlu1 %1900, %v2336_v36  }
 0x2dd   :  { %1902 = vset.pattern.permute.xlu1 %v2571_v47 }
 0x2de   :  { %1067 = vperm.xlu1 %1902, %v2336_v36  }
 0x2e2   :  { %1903 = vset.pattern.permute.xlu1 %v2572_v48 }
 0x2e3   :  { %1082 = vperm.xlu1 %1903, %v2336_v36  }
 0x2e7   :  { %1905 = vset.pattern.permute.xlu1 %v2573_v49  ;;  %v818_v49 = vrot.slane %v684_v45, %v2088_v23 }
 0x2e8   :  { %1112 = vperm.xlu1 %1905, %v2336_v36  }
 0x2ec   :  { %1906 = vset.pattern.permute.xlu1 %v2574_v50  ;;  %v688_v50 = vld [vmem:[%s2555_s8 + $0x8] sm:$0xff] }
 0x2ed   :  { %1127 = vperm.xlu1 %1906, %v2336_v36  }
 0x2f1   :  { %1908 = vset.pattern.permute.xlu1 %v1965_v19 }
 0x2f2   :  { %1157 = vperm.xlu1 %1908, %v2336_v36  }
 0x30d   :  { %v708_v56 = vpop.permute.xlu1 %707  ;;  %v694_v59 = vpop.permute.xlu0 %693 }
 0x30e   :  { %v714_v61 = vmul.f32 %v713_v53, %v708_v56  ;;  %v700_v62 = vmul.f32 %v699_v54, %v694_v59  ;;  %v823_v59 = vrot.slane %v688_v50, %v2088_v23 }
 0x310   :  { %v719_v19 = vadd.f32 %v718_v55, %v714_v61  ;;  %v705_v60 = vadd.f32 %v704_v57, %v700_v62 }
 0x312   :  { %v723_v11 = vpop.permute.xlu1 %722  ;;  %v738_v42 = vpop.permute.xlu0 %737  ;;  %v720_v12 = vmul.f32 %v719_v19, %v705_v60  ;;  %v848_v19 = vrot.slane %v684_v45, %v2072_v13  ;;  %v838_v60 = vrot.slane %v688_v50, %v2061_v8 }
 0x313   :  { %v729_v21 = vmul.f32 %v728_v18, %v723_v11  ;;  %v744_v32 = vmul.f32 %v743_v22, %v738_v42 }
 0x315   :  { %v734_v20 = vadd.f32 %v733_v24, %v729_v21  ;;  %v749_v15 = vadd.f32 %v748_v25, %v744_v32  ;;  %v853_v21 = vrot.slane %v688_v50, %v2072_v13  ;;  %v863_v25 = vrot.slane %v684_v45, %v2064_v9 }
 0x316   :  { %v878_v32 = vrot.slane %v684_v45, %v2198_v37 }
 0x317   :  { %v735_v7 = vmul.f32 %v734_v20, %v720_v12  ;;  %v753_v14 = vpop.permute.xlu1 %752  ;;  %v783_v3 = vpop.permute.xlu0 %782 }
 0x318   :  { %v759_v31 = vmul.f32 %v758_v39, %v753_v14  ;;  %v789_v26 = vmul.f32 %v788_v1, %v783_v3  ;;  %v868_v14 = vrot.slane %v688_v50, %v2064_v9 }
 0x319   :  { %v750_v28 = vmul.f32 %v749_v15, %v735_v7 }
 0x31a   :  { %v764_v35 = vadd.f32 %v763_v16, %v759_v31  ;;  %v794_v47 = vadd.f32 %v793_v58, %v789_v26  ;;  %v908_v26 = vrot.slane %v684_v45, %v2209_v30 }
 0x31c   :  { %v768_v10 = vpop.permute.xlu1 %767  ;;  %v765_v38 = vmul.f32 %v764_v35, %v750_v28  ;;  %v828_v61 = vpop.permute.xlu0 %827  ;;  %v893_v28 = vrot.slane %v684_v45, %v2202_v41  ;;  %v883_v35 = vrot.slane %v688_v50, %v2198_v37 }
 0x31d   :  { %v774_v27 = vmul.f32 %v773_v33, %v768_v10  ;;  %v834_v24 = vmul.f32 %v833_v52, %v828_v61 }
 0x31f   :  { %v779_v6 = vadd.f32 %v778_v29, %v774_v27  ;;  %v839_v20 = vadd.f32 %v838_v60, %v834_v24  ;;  %v898_v27 = vrot.slane %v688_v50, %v2202_v41 }
 0x321   :  { %v780_v44 = vmul.f32 %v779_v6, %v765_v38  ;;  %v798_v0 = vpop.permute.xlu1 %797  ;;  %v1474_v46 = vpop.f32.mrb[4].mxu1  ;;  %v923_v6 = vrot.slane %v684_v45, %v2213_v34  ;;  %v689_v45 = vld [vmem:[%s2555_s8 + $0x10] sm:$0xff] }
 0x322   :  { %v804_v2 = vmul.f32 %v803_v63, %v798_v0  ;;  %vm1487_vm14 = vcmp.gt.f32.partialorder %v1474_v46, %v1672_v43  ;;  %v1741_v48 = vpop.f32.mrb[5].mxu1  ;;  %v873_v31 = vpop.permute.xlu0 %872  ;;  %v685_v46 = vld [vmem:[%s2554_s7 + $0x10] sm:$0xff] }
 0x323   :  { %v1488_v53 = vsel %vm1487_vm14, 1.0, %v2575_v51  ;;  %v1477_v54 = vpop.f32.mrb[6].mxu1  ;;  %v795_v55 = vmul.f32 %v794_v47, %v780_v44  ;;  %v879_v1 = vmul.f32 %v878_v32, %v873_v31  ;;  %v938_v48 = vrot.slane %v685_v46, %v2088_v23 }
 0x324   :  { %v809_v56 = vadd.f32 %v808_v5, %v804_v2  ;;  %v1742_v57 = vpop.f32.mrb[7].mxu1  ;;  %1752 = vmatmul.mubr.msk.f32.vlgmr.msra.gmra.mrb[8].mxu1 %vm1183_vm12, %v1488_v53  ;;  %v913_v5 = vrot.slane %v688_v50, %v2209_v30  ;;  %v988_v32 = vrot.slane %v689_v45, %v2064_v9  ;;  %v998_v31 = vrot.slane %v685_v46, %v2198_v37 }
 0x325   :  { %v884_v58 = vadd.f32 %v883_v35, %v879_v1  ;;  %v1003_v35 = vrot.slane %v689_v45, %v2198_v37 }
 0x326   :  { %v813_v62 = vpop.permute.xlu1 %812  ;;  %v810_v22 = vmul.f32 %v809_v56, %v795_v55  ;;  %v918_v0 = vpop.permute.xlu0 %917  ;;  %v943_v56 = vrot.slane %v689_v45, %v2088_v23 }
 0x327   :  { %v819_v18 = vmul.f32 %v818_v49, %v813_v62  ;;  %v928_v49 = vrot.slane %v688_v50, %v2213_v34  ;;  %v924_v53 = vmul.f32 %v923_v6, %v918_v0  ;;  %v953_v62 = vrot.slane %v685_v46, %v2061_v8 }
 0x328   :  { %v958_v50 = vrot.slane %v689_v45, %v2061_v8  ;;  %v1033_v6 = vrot.slane %v689_v45, %v2209_v30 }
 0x329   :  { %v824_v11 = vadd.f32 %v823_v59, %v819_v18  ;;  %v929_v61 = vadd.f32 %v928_v49, %v924_v53  ;;  %v968_v18 = vrot.slane %v685_v46, %v2072_v13  ;;  %v1048_v53 = vrot.slane %v689_v45, %v2213_v34 }
 0x32b   :  { %v825_v42 = vmul.f32 %v824_v11, %v810_v22  ;;  %v843_v39 = vpop.permute.xlu1 %842  ;;  %v963_v24 = vpop.permute.xlu0 %962 }
 0x32c   :  { %v849_v12 = vmul.f32 %v848_v19, %v843_v39  ;;  %v969_v39 = vmul.f32 %v968_v18, %v963_v24 }
 0x32d   :  { %v840_v7 = vmul.f32 %v839_v20, %v825_v42  ;;  %v983_v42 = vrot.slane %v685_v46, %v2064_v9 }
 0x32e   :  { %v854_v16 = vadd.f32 %v853_v21, %v849_v12  ;;  %v973_v21 = vrot.slane %v689_v45, %v2072_v13 }
 0x330   :  { %v858_v15 = vpop.permute.xlu1 %857  ;;  %v855_v29 = vmul.f32 %v854_v16, %v840_v7  ;;  %v1008_v1 = vpop.permute.xlu0 %1007 }
 0x331   :  { %v864_v33 = vmul.f32 %v863_v25, %v858_v15  ;;  %v1013_v15 = vrot.slane %v685_v46, %v2202_v41 }
 0x333   :  { %v869_v3 = vadd.f32 %v868_v14, %v864_v33  ;;  %v974_v14 = vadd.f32 %v973_v21, %v969_v39 }
 0x335   :  { %v870_v10 = vmul.f32 %v869_v3, %v855_v29  ;;  %v888_v63 = vpop.permute.xlu1 %887 }
 0x336   :  { %v894_v38 = vmul.f32 %v893_v28, %v888_v63  ;;  %v1014_v63 = vmul.f32 %v1013_v15, %v1008_v1 }
 0x337   :  { %v885_v43 = vmul.f32 %v884_v58, %v870_v10  ;;  %v1028_v10 = vrot.slane %v685_v46, %v2209_v30 }
 0x338   :  { %v899_v44 = vadd.f32 %v898_v27, %v894_v38  ;;  %v1018_v27 = vrot.slane %v689_v45, %v2202_v41 }
 0x33a   :  { %v903_v2 = vpop.permute.xlu1 %902  ;;  %v900_v54 = vmul.f32 %v899_v44, %v885_v43  ;;  %v686_v44 = vld [vmem:[%s2554_s7 + $0x18] sm:$0xff]  ;;  %v1019_v0 = vadd.f32 %v1018_v27, %v1014_v63 }
 0x33b   :  { %v909_v47 = vmul.f32 %v908_v26, %v903_v2  ;;  %v1043_v2 = vrot.slane %v685_v46, %v2213_v34  ;;  %v1088_v24 = vrot.slane %v686_v44, %v2072_v13 }
 0x33d   :  { %v914_v52 = vadd.f32 %v913_v5, %v909_v47  ;;  %v1058_v47 = vrot.slane %v686_v44, %v2088_v23 }
 0x33f   :  { %v915_v55 = vmul.f32 %v914_v52, %v900_v54  ;;  %v933_v57 = vpop.permute.xlu1 %932  ;;  %v690_v54 = vld [vmem:[%s2555_s8 + $0x18] sm:$0xff]  ;;  %v1053_v52 = vpop.permute.xlu0 %1052 }
 0x340   :  { %v939_v59 = vmul.f32 %v938_v48, %v933_v57  ;;  %v1073_v57 = vrot.slane %v686_v44, %v2061_v8  ;;  %v1093_v21 = vrot.slane %v690_v54, %v2072_v13  ;;  %v1133_v13 = vrot.slane %v686_v44, %v2202_v41 }
 0x341   :  { %v930_v19 = vmul.f32 %v929_v61, %v915_v55  ;;  %v1059_v61 = vmul.f32 %v1058_v47, %v1053_v52 }
 0x342   :  { %v944_v60 = vadd.f32 %v943_v56, %v939_v59  ;;  %v1063_v59 = vrot.slane %v690_v54, %v2088_v23 }
 0x343   :  { %v1098_v39 = vpop.permute.xlu0 %1097 }
 0x344   :  { %v948_v22 = vpop.permute.xlu1 %947  ;;  %v945_v12 = vmul.f32 %v944_v60, %v930_v19  ;;  %v1078_v19 = vrot.slane %v690_v54, %v2061_v8  ;;  %v1064_v45 = vadd.f32 %v1063_v59, %v1059_v61 }
 0x345   :  { %v954_v11 = vmul.f32 %v953_v62, %v948_v22  ;;  %v1103_v22 = vrot.slane %v686_v44, %v2064_v9 }
 0x347   :  { %v959_v20 = vadd.f32 %v958_v50, %v954_v11 }
 0x349   :  { %v960_v25 = vmul.f32 %v959_v20, %v945_v12  ;;  %v978_v7 = vpop.permute.xlu1 %977  ;;  %v1118_v20 = vrot.slane %v686_v44, %v2198_v37 }
 0x34a   :  { %v984_v16 = vmul.f32 %v983_v42, %v978_v7 }
 0x34b   :  { %v975_v33 = vmul.f32 %v974_v14, %v960_v25  ;;  %v1108_v25 = vrot.slane %v690_v54, %v2064_v9  ;;  %v1123_v14 = vrot.slane %v690_v54, %v2198_v37  ;;  %v1153_v9 = vrot.slane %v690_v54, %v2209_v30 }
 0x34c   :  { %v989_v28 = vadd.f32 %v988_v32, %v984_v16  ;;  %v1104_v32 = vmul.f32 %v1103_v22, %v1098_v39 }
 0x34e   :  { %v993_v29 = vpop.permute.xlu1 %992  ;;  %v990_v38 = vmul.f32 %v989_v28, %v975_v33  ;;  %v1109_v33 = vadd.f32 %v1108_v25, %v1104_v32  ;;  %v1148_v28 = vrot.slane %v686_v44, %v2209_v30 }
 0x34f   :  { %v999_v3 = vmul.f32 %v998_v31, %v993_v29 }
 0x351   :  { %v1004_v58 = vadd.f32 %v1003_v35, %v999_v3  ;;  %v1143_v35 = vpop.permute.xlu0 %1142  ;;  %v1138_v3 = vrot.slane %v690_v54, %v2202_v41 }
 0x352   :  { %v1149_v27 = vmul.f32 %v1148_v28, %v1143_v35 }
 0x353   :  { %v1005_v26 = vmul.f32 %v1004_v58, %v990_v38  ;;  %v1023_v43 = vpop.permute.xlu1 %1022  ;;  %v1163_v38 = vrot.slane %v686_v44, %v2213_v34  ;;  %v1264_v44 = vld [vmem:[%s2557_s11] sm:$0xff] }
 0x354   :  { %v1029_v5 = vmul.f32 %v1028_v10, %v1023_v43 }
 0x355   :  { %v1020_v48 = vmul.f32 %v1019_v0, %v1005_v26  ;;  %v1168_v26 = vrot.slane %v690_v54, %v2213_v34  ;;  %v1265_v34 = vld [vmem:[%s2557_s11 + $0x8] sm:$0xff] }
 0x356   :  { %v1034_v49 = vadd.f32 %v1033_v6, %v1029_v5  ;;  %v1154_v6 = vadd.f32 %v1153_v9, %v1149_v27 }
 0x358   :  { %v1038_v55 = vpop.permute.xlu1 %1037  ;;  %v1035_v62 = vmul.f32 %v1034_v49, %v1020_v48 }
 0x359   :  { %v1044_v56 = vmul.f32 %v1043_v2, %v1038_v55  ;;  %v1772_v55 = vpack.c.bf16 %v1265_v34, %v1264_v44 }
 0x35b   :  { %v1049_v46 = vadd.f32 %v1048_v53, %v1044_v56  ;;  %v1266_v56 = vld [vmem:[%s2557_s11 + $0x10] sm:$0xff] }
 0x35d   :  { %v1050_v18 = vmul.f32 %v1049_v46, %v1035_v62  ;;  %v1068_v60 = vpop.permute.xlu1 %1067  ;;  %v1674_v46 = vld [vmem:[%s2558_s12] ss:$0 sm:$0xff] }
 0x35e   :  { %v1074_v50 = vmul.f32 %v1073_v57, %v1068_v60  ;;  %v1267_v57 = vld [vmem:[%s2557_s11 + $0x18] sm:$0xff] }
 0x35f   :  { %v1065_v11 = vmul.f32 %v1064_v45, %v1050_v18  ;;  %v1775_v61 = vpack.c.bf16 %v1267_v57, %v1266_v56 }
 0x360   :  { %v1079_v42 = vadd.f32 %v1078_v19, %v1074_v50 }
 0x362   :  { %v1083_v12 = vpop.permute.xlu1 %1082  ;;  %v1080_v8 = vmul.f32 %v1079_v42, %v1065_v11 }
 0x363   :  { %v1089_v23 = vmul.f32 %v1088_v24, %v1083_v12 }
 0x365   :  { %v1094_v7 = vadd.f32 %v1093_v21, %v1089_v23 }
 0x367   :  { %v1095_v16 = vmul.f32 %v1094_v7, %v1080_v8  ;;  %v1113_v31 = vpop.permute.xlu1 %1112 }
 0x368   :  { %v1119_v15 = vmul.f32 %v1118_v20, %v1113_v31 }
 0x369   :  { %v1110_v1 = vmul.f32 %v1109_v33, %v1095_v16 }
 0x36a   :  { %v1124_v29 = vadd.f32 %v1123_v14, %v1119_v15 }
 0x36c   :  { %v1128_v10 = vpop.permute.xlu1 %1127  ;;  %v1125_v37 = vmul.f32 %v1124_v29, %v1110_v1 }
 0x36d   :  { %v1134_v63 = vmul.f32 %v1133_v13, %v1128_v10 }
 0x36f   :  { %v1139_v58 = vadd.f32 %v1138_v3, %v1134_v63 }
 0x371   :  { %v1140_v43 = vmul.f32 %v1139_v58, %v1125_v37  ;;  %v1158_v5 = vpop.permute.xlu1 %1157 }
 0x372   :  { %v1164_v0 = vmul.f32 %v1163_v38, %v1158_v5 }
 0x373   :  { %v1155_v2 = vmul.f32 %v1154_v6, %v1140_v43 }
 0x374   :  { %v1169_v47 = vadd.f32 %v1168_v26, %v1164_v0 }
 0x376   :  { %v1170_v48 = vmul.f32 %v1169_v47, %v1155_v2 }
 0x378   :  { %v1171_v49 = vmax.f32 %v1170_v48, 1e-30 }
 0x37a   :  { %1921 = vlog2.f32 %v1171_v49 }
 0x384   :  { %v1922_v41 = vpop.eup %1921 }
 0x385   :  { %v1173_v53 = vmul.f32 0.6931472, %v1922_v41 }
 0x387   :  { %v1174_v30 = vsub.f32 1.0, %v1173_v53 }
 0x389   :  { %1923 = vrcp.f32 %v1174_v30 }
 0x393   :  { %v1924_v54 = vpop.eup %1923 }
 0x394   :  { %v1176_v52 = vsub.f32 1.0, %v1924_v54 }
 0x396   :  { %v1177_v59 = vsel %vm680_vm13, %v1924_v54, %v1176_v52 }
 0x397   :  { %1712 = vmatmul.mubr.msk.f32.vlgmr.msra.gmra.mrb[0].mxu0 %vm1183_vm12, %v1177_v59 }
 0x398   :  { %1773 = vmatpush3.bf16.msra.mxu0 %v1772_v55  ;;  %1722 = vmatprep.mubr.msk.f32.mxu0 %vm1935_vm5, %v2575_v51 }
 0x399   :  { %1774 = vmatprep.subr.bf16.mxu0 %v1967_v4 }
 0x39c   :  { %1776 = vmatpush3.bf16.msra.mxu0 %v1775_v61 }
 0x39d   :  { %1783 = vmatprep.subr.bf16.mxu0 %v1967_v4 }
 0x39f   :  { %1723 = vmatmul.mubr.msk.f32.vlgmr.msra.gmra.mrb[0].mxu0 %vm1183_vm12, %v2336_v36 }
 0x3a0   :  { %1785 = vmatpush3.bf16.msra.mxu0 %v1772_v55  ;;  %1762 = vmatprep.mubr.msk.f32.mxu0 %vm1935_vm5, %v2575_v51 }
 0x3a1   :  { %1786 = vmatprep.subr.bf16.mxu0 %v1967_v4 }
 0x3a4   :  { %1788 = vmatpush3.bf16.msra.mxu0 %v1775_v61 }
 0x3a7   :  { %1763 = vmatmul.mubr.msk.f32.vlgmr.msra.gmra.mrb[2].mxu0 %vm1183_vm12, %v2283_v40 }
 0x3f7   :  { %v1563_v17 = vpop.f32.mrb[8].mxu1 }
 0x3f8   :  { %v1753_v62 = vpop.f32.mrb[9].mxu1  ;;  %v1573_v36 = vadd.f32 %v1674_v46, %v1563_v17 }
 0x472   :  { %v1336_v18 = vpop.f32.mrb[0].mxu0 }
 0x473   :  { %v1789_v19 = vadd.f32 %v1674_v46, %v1336_v18  ;;  %v1724_v60 = vpop.f32.mrb[1].mxu0 }
 0x475   :  { %1341 = vst [vmem:[%s2559_s13] sm:$0xff] %v1789_v19 }
 0x47a   :  { %v1647_v51 = vpop.f32.mrb[2].mxu0 }
 0x47b   :  { %v1651_v4 = vadd.f32 %v1647_v51, %v1573_v36  ;;  %v1764_v50 = vpop.f32.mrb[3].mxu0 }
 0x47d   :  { %1652 = vst [vmem:[%s2560_s14] sm:$0xff] %v1651_v4 }

</bundles_post_ra>
